<compile_context>
chip_gen: v7x
topology: tpu7x:2x2x1
jax: 0.10.0
libtpu: 0.0.40
codegen_flags: <defaults>
</compile_context>

<pallas_src>
import functools
import math

import jax
import jax.numpy as jnp
from jax.experimental import pallas as pl
from jax.experimental.pallas import tpu as pltpu

CPAD = 128   # every channel-like dim padded to one 128-lane vreg width
KPAD = 32    # im2col K = Cin*9 = 27, padded to 32 (per branch)


def _erf(x):
    # Abramowitz & Stegun 7.1.26, |error| <= 1.5e-7. Uses only exp / div / where.
    p = 0.3275911
    a1, a2, a3, a4, a5 = 0.254829592, -0.284496736, 1.421413741, -1.453152027, 1.061405429
    s = jnp.where(x >= 0.0, 1.0, -1.0)
    ax = jnp.abs(x)
    t = 1.0 / (1.0 + p * ax)
    poly = ((((a5 * t + a4) * t + a3) * t + a2) * t + a1) * t
    return s * (1.0 - poly * jnp.exp(-ax * ax))


def _gelu(x):
    return 0.5 * x * (1.0 + _erf(x * (1.0 / math.sqrt(2.0))))


# ----------------------------------------------------------------------------
# The single fused kernel
# ----------------------------------------------------------------------------
def _fused_kernel(patch_ref, pool_ref, wwide_ref, wnar_ref, b_ref, out_ref, *, C, heads):
    """Whole forward pass in one kernel body.

    patch_ref: (B*HW, 2*KPAD)  bf16  lane-stacked im2col rows [svd | ent]
    pool_ref:  (B, B*HW)       bf16  global-average-pool one-hot (1/HW entries)
    wwide_ref: (2*KPAD+CPAD, 3*CPAD) bf16  [block-diag conv weights ; merged q|k|v]
    wnar_ref:  (4*CPAD, CPAD)  bf16  [wo ; w1(+seg,+wc in spare lanes) ; w2 ; head-expand]
    b_ref:     (16, 3*CPAD)    f32   biases / LayerNorm gamma,beta (zero-padded lanes)
    out_ref:   (B, CPAD)       f32   logits at lanes [2C+heads : 2C+heads+num_classes)
    """
    f32, bf16 = jnp.float32, jnp.bfloat16
    dh = C // heads
    scale = 1.0 / math.sqrt(dh)

    O_QKV = 2 * KPAD                                        # rows in the wide slab
    O_WO, O_W1, O_W2, O_EXP = 0, CPAD, 2 * CPAD, 3 * CPAD   # rows in the narrow slab

    def brow(row, width=CPAD):
        return b_ref[row:row + 1, 0:width]                  # f32 bias / LN row

    # ---- both conv branches as ONE block-diagonal matmul + bias + ReLU ----
    act = jnp.dot(patch_ref[...], wwide_ref[0:2 * KPAD, 0:2 * CPAD],
                  preferred_element_type=f32)
    act = jnp.maximum(act + brow(0, 2 * CPAD), 0.0)                     # (B*HW, 2*CPAD)

    # ---- global average pooling as one matmul (MXU, not XLU) ----
    pooled = jnp.dot(pool_ref[...], act.astype(bf16), preferred_element_type=f32)
    feat_s = pooled[:, 0:CPAD]               # (B, CPAD) free 128-lane slices
    feat_e = pooled[:, CPAD:2 * CPAD]

    # ---- CrossAttentionFusion: merged q|k|v projection, tokens kept separate ----
    wqkv = wwide_ref[O_QKV:O_QKV + CPAD, :]
    bqkv = b_ref[1:2, :]
    prj_s = jnp.dot(feat_s.astype(bf16), wqkv, preferred_element_type=f32) + bqkv
    prj_e = jnp.dot(feat_e.astype(bf16), wqkv, preferred_element_type=f32) + bqkv
    q_s, k_s, v_s = prj_s[:, 0:CPAD], prj_s[:, CPAD:2 * CPAD], prj_s[:, 2 * CPAD:]
    q_e, k_e, v_e = prj_e[:, 0:CPAD], prj_e[:, CPAD:2 * CPAD], prj_e[:, 2 * CPAD:]
    dk = k_e - k_s
    dv = v_e - v_s

    # Per-head score difference (cross - self) via the segment-sum columns stored in the
    # w1 block's dead lanes (cols [2C, 2C+heads)).  2-key softmax == sigmoid of the diff.
    w1blk = wnar_ref[O_W1:O_W1 + CPAD, :]
    t_s = jnp.dot((q_s * dk).astype(bf16), w1blk, preferred_element_type=f32)
    t_e = jnp.dot((q_e * dk).astype(bf16), w1blk, preferred_element_type=f32)
    p_s = 1.0 / (1.0 + jnp.exp(-scale * t_s))      # exact softmax-of-2 (cross prob)
    p_e = 1.0 / (1.0 + jnp.exp(scale * t_e))
    # Broadcast per-head prob back to its channel lanes; expand block rows outside
    # [2C, 2C+heads) are zero, so the garbage lanes of p_* contribute nothing.
    expand = wnar_ref[O_EXP:O_EXP + CPAD, :]
    pb_s = jnp.dot(p_s.astype(bf16), expand, preferred_element_type=f32)
    pb_e = jnp.dot(p_e.astype(bf16), expand, preferred_element_type=f32)
    o_s = v_s + pb_s * dv
    o_e = v_e - pb_e * dv
    woblk = wnar_ref[O_WO:O_WO + CPAD, :]
    bo = brow(2)
    attn_s = jnp.dot(o_s.astype(bf16), woblk, preferred_element_type=f32) + bo
    attn_e = jnp.dot(o_e.astype(bf16), woblk, preferred_element_type=f32) + bo

    def layernorm(x, g, b):
        # padded lanes of x are exactly 0 -> full-lane sums equal real-lane sums
        s1 = jnp.sum(x, axis=-1, keepdims=True)
        s2 = jnp.sum(x * x, axis=-1, keepdims=True)
        mu = s1 * (1.0 / C)
        var = s2 * (1.0 / C) - mu * mu
        return (x - mu) * jax.lax.rsqrt(var + 1e-5) * g + b

    ln1g, ln1b = brow(3), brow(4)
    x_s = layernorm(feat_s + attn_s, ln1g, ln1b)
    x_e = layernorm(feat_e + attn_e, ln1g, ln1b)

    b1, b2 = brow(5), brow(6)
    w2blk = wnar_ref[O_W2:O_W2 + CPAD, :]

    def mlp(x):
        # h's lanes >= 2C hold harmless garbage (seg/wc columns); w2 block rows there are 0.
        h = _gelu(jnp.dot(x.astype(bf16), w1blk, preferred_element_type=f32) + b1)
        return x + jnp.dot(h.astype(bf16), w2blk, preferred_element_type=f32) + b2

    x_s = mlp(x_s)
    x_e = mlp(x_e)

    fused = 0.5 * (x_s + x_e)                       # mean over the 2 tokens
    z = layernorm(fused, brow(7), brow(8))
    # classifier uses the wc columns packed into the w1 block; lane-dense 128-wide store,
    # logits live at lanes [2C+heads : 2C+heads+num_classes).
    out_ref[...] = jnp.dot(z.astype(bf16), w1blk, preferred_element_type=f32) + brow(9)


# ----------------------------------------------------------------------------
# Wrapper: im2col, parameter packing (done once, outside jit), single pallas_call
# ----------------------------------------------------------------------------
def im2col_3x3(x):
    """x: (B, Cin, H, W) NCHW, 3x3 conv, padding=1 -> (B, H*W, Cin*9)."""
    B, Cin, H, W = x.shape
    xp = jnp.pad(x, ((0, 0), (0, 0), (1, 1), (1, 1)))
    cols = [xp[:, :, di:di + H, dj:dj + W] for di in range(3) for dj in range(3)]
    p = jnp.stack(cols, axis=2)                       # (B, Cin, 9, H, W)
    p = p.reshape(B, Cin * 9, H, W)
    return p.transpose(0, 2, 3, 1).reshape(B, H * W, Cin * 9)


def pack_params(p, *, batch, hw, num_heads, num_classes):
    """Pack all parameters into bf16 weight slabs + one f32 bias slab, zero-padded so
    padded channel lanes stay exactly zero through the whole network.  Runs ONCE."""
    C = p["wq"].shape[0]
    K = p["svd_w"].shape[0]
    dh = C // num_heads
    assert K <= KPAD and 2 * C + num_heads + num_classes <= CPAD
    bf = jnp.bfloat16

    # --- wide slab: block-diag conv weights + merged q|k|v projection ---
    wconv = jnp.zeros((2 * KPAD, 3 * CPAD), jnp.float32)
    wconv = wconv.at[0:K, 0:C].set(p["svd_w"])
    wconv = wconv.at[KPAD:KPAD + K, CPAD:CPAD + C].set(p["ent_w"])
    wqkv = jnp.zeros((CPAD, 3 * CPAD), jnp.float32)
    wqkv = wqkv.at[0:C, 0:C].set(p["wq"])
    wqkv = wqkv.at[0:C, CPAD:CPAD + C].set(p["wk"])
    wqkv = wqkv.at[0:C, 2 * CPAD:2 * CPAD + C].set(p["wv"])
    wwide = jnp.concatenate([wconv, wqkv], axis=0).astype(bf)      # (2*KPAD+CPAD, 3*CPAD)

    # --- narrow slab: wo | w1 (+seg, +wc in spare lanes) | w2 | head-expand ---
    seg = (jnp.arange(C)[:, None] // dh == jnp.arange(num_heads)[None, :]).astype(jnp.float32)
    wo = jnp.zeros((CPAD, CPAD), jnp.float32).at[0:C, 0:C].set(p["wo"])
    w1 = jnp.zeros((CPAD, CPAD), jnp.float32)
    w1 = w1.at[0:C, 0:2 * C].set(p["w1"])
    w1 = w1.at[0:C, 2 * C:2 * C + num_heads].set(seg)
    w1 = w1.at[0:C, 2 * C + num_heads:2 * C + num_heads + num_classes].set(p["wc"])
    w2 = jnp.zeros((CPAD, CPAD), jnp.float32).at[0:2 * C, 0:C].set(p["w2"])
    expand = jnp.zeros((CPAD, CPAD), jnp.float32).at[2 * C:2 * C + num_heads, 0:C].set(seg.T)
    wnar = jnp.concatenate([wo, w1, w2, expand], axis=0).astype(bf)  # (4*CPAD, CPAD)

    # --- f32 bias / LayerNorm slab ---
    b = jnp.zeros((16, 3 * CPAD), jnp.float32)
    b = b.at[0, 0:C].set(p["svd_b"].reshape(-1))
    b = b.at[0, CPAD:CPAD + C].set(p["ent_b"].reshape(-1))
    b = b.at[1, 0:C].set(p["bq"].reshape(-1))
    b = b.at[1, CPAD:CPAD + C].set(p["bk"].reshape(-1))
    b = b.at[1, 2 * CPAD:2 * CPAD + C].set(p["bv"].reshape(-1))
    b = b.at[2, 0:C].set(p["bo"].reshape(-1))
    b = b.at[3, 0:C].set(p["ln1w"].reshape(-1))
    b = b.at[4, 0:C].set(p["ln1b"].reshape(-1))
    b = b.at[5, 0:2 * C].set(p["b1"].reshape(-1))
    b = b.at[6, 0:C].set(p["b2"].reshape(-1))
    b = b.at[7, 0:C].set(p["ln2w"].reshape(-1))
    b = b.at[8, 0:C].set(p["ln2b"].reshape(-1))
    b = b.at[9, 2 * C + num_heads:2 * C + num_heads + num_classes].set(p["bc"].reshape(-1))

    # --- global-average-pool one-hot (1/HW is exact in bf16 when HW is a power of two) ---
    r = jnp.arange(batch)[:, None]
    c = jnp.arange(batch * hw)[None, :]
    pool = jnp.where(r == c // hw, 1.0 / hw, 0.0).astype(bf)

    return {"pool": pool, "wwide": wwide, "wnar": wnar, "bias": b}


def dual_branch_forward(packed, x_svd, x_ent, *, feat_dim, num_heads, num_classes):
    B, _, H, W = x_svd.shape
    HW = H * W
    # im2col stays in the wrapper (tiny patch slab; avoids Cin=3-lane transposes in-kernel).
    p_svd = im2col_3x3(x_svd).reshape(B * HW, -1)
    p_ent = im2col_3x3(x_ent).reshape(B * HW, -1)
    K = p_svd.shape[-1]
    patches = jnp.concatenate(
        [jnp.pad(p_svd, ((0, 0), (0, KPAD - K))),
         jnp.pad(p_ent, ((0, 0), (0, KPAD - K)))], axis=1).astype(jnp.bfloat16)

    kern = functools.partial(_fused_kernel, C=feat_dim, heads=num_heads)
    vmem = pl.BlockSpec(memory_space=pltpu.MemorySpace.VMEM)
    out = pl.pallas_call(
        kern,
        out_shape=jax.ShapeDtypeStruct((B, CPAD), jnp.float32),
        in_specs=[vmem, vmem, vmem, vmem, vmem],
        out_specs=vmem,
    )(patches, packed["pool"], packed["wwide"], packed["wnar"], packed["bias"])
    off = 2 * feat_dim + num_heads
    return out[:, off:off + num_classes]


# ----------------------------------------------------------------------------
# Parameter init (logical / unpadded shapes) + pure-JAX f32 reference
# ----------------------------------------------------------------------------
def init_params(key, cin=3, feat_dim=32, num_classes=2):
    ks = list(jax.random.split(key, 16))
    s = 0.05
    C = feat_dim

    def w(k, shape):
        return (s * jax.random.normal(k, shape)).astype(jnp.float32)

    p = {}
    # two independent backbones (svd / ent): Conv2d(cin, C, 3, padding=1) + bias
    svd_cw = w(ks[0], (C, cin, 3, 3))
    ent_cw = w(ks[1], (C, cin, 3, 3))
    p["svd_w"] = svd_cw.reshape(C, cin * 9).T         # (27, C)
    p["ent_w"] = ent_cw.reshape(C, cin * 9).T
    p["svd_b"] = w(ks[2], (1, C))
    p["ent_b"] = w(ks[3], (1, C))
    # CrossAttentionFusion: MultiheadAttention(dim=C, heads=4)
    in_proj = w(ks[4], (3 * C, C))                    # torch in_proj_weight (3C, C)
    in_bias = w(ks[5], (3 * C,))
    p["wq"], p["wk"], p["wv"] = (in_proj[0:C].T, in_proj[C:2 * C].T, in_proj[2 * C:].T)
    p["bq"], p["bk"], p["bv"] = (in_bias[0:C][None], in_bias[C:2 * C][None], in_bias[2 * C:][None])
    p["wo"] = w(ks[6], (C, C)).T                      # out_proj weight (transposed)
    p["bo"] = w(ks[7], (1, C))
    p["ln1w"] = jnp.ones((1, C), jnp.float32)
    p["ln1b"] = jnp.zeros((1, C), jnp.float32)
    p["w1"] = w(ks[8], (2 * C, C)).T                  # Linear(C, 2C)
    p["b1"] = w(ks[9], (1, 2 * C))
    p["w2"] = w(ks[10], (C, 2 * C)).T                 # Linear(2C, C)
    p["b2"] = w(ks[11], (1, C))
    # classifier: LayerNorm(C) + Dropout(eval no-op) + Linear(C, num_classes)
    p["ln2w"] = jnp.ones((1, C), jnp.float32)
    p["ln2b"] = jnp.zeros((1, C), jnp.float32)
    p["wc"] = w(ks[12], (num_classes, C)).T
    p["bc"] = w(ks[13], (1, num_classes))
    return p


def reference_forward(params, x_svd, x_ent, num_heads=4):
    C = params["wq"].shape[0]
    dh = C // num_heads

    def backbone(x, w_, b_):
        p_ = im2col_3x3(x)
        y = jnp.maximum(jnp.einsum("bpk,kc->bpc", p_, w_) + b_, 0.0)
        return jnp.mean(y, axis=1)

    def ln(x, w_, b_):
        mu = x.mean(-1, keepdims=True)
        var = ((x - mu) ** 2).mean(-1, keepdims=True)
        return (x - mu) / jnp.sqrt(var + 1e-5) * w_ + b_

    s = backbone(x_svd, params["svd_w"], params["svd_b"])
    e = backbone(x_ent, params["ent_w"], params["ent_b"])
    B = s.shape[0]
    x = jnp.stack([s, e], axis=1)                     # (B, 2, C)
    q = (x @ params["wq"] + params["bq"]).reshape(B, 2, num_heads, dh).transpose(0, 2, 1, 3)
    k = (x @ params["wk"] + params["bk"]).reshape(B, 2, num_heads, dh).transpose(0, 2, 1, 3)
    v = (x @ params["wv"] + params["bv"]).reshape(B, 2, num_heads, dh).transpose(0, 2, 1, 3)
    att = jax.nn.softmax(q @ jnp.swapaxes(k, -1, -2) / math.sqrt(dh), axis=-1)
    o = (att @ v).transpose(0, 2, 1, 3).reshape(B, 2, C) @ params["wo"] + params["bo"]
    x = ln(x + o, params["ln1w"], params["ln1b"])
    h = x @ params["w1"] + params["b1"]
    h = 0.5 * h * (1.0 + jax.lax.erf(h / math.sqrt(2.0)))
    x = x + h @ params["w2"] + params["b2"]
    fused = x.mean(axis=1)
    z = ln(fused, params["ln2w"], params["ln2b"])
    return z @ params["wc"] + params["bc"]


if __name__ == "__main__":
    B, CIN, H, W = 2, 3, 16, 16
    FEAT_DIM, HEADS, NUM_CLASSES = 32, 4, 2

    root = jax.random.PRNGKey(0)
    k_params, k_svd, k_ent = jax.random.split(root, 3)
    params = init_params(k_params, cin=CIN, feat_dim=FEAT_DIM, num_classes=NUM_CLASSES)
    x_svd = jax.random.normal(k_svd, (B, CIN, H, W), jnp.float32)
    x_ent = jax.random.normal(k_ent, (B, CIN, H, W), jnp.float32)

    # Parameter packing / padding / bf16 cast done ONCE, outside the per-step jit path.
    packed = pack_params(params, batch=B, hw=H * W, num_heads=HEADS, num_classes=NUM_CLASSES)
    packed = jax.device_put(packed)

    fwd = jax.jit(functools.partial(dual_branch_forward, feat_dim=FEAT_DIM,
                                    num_heads=HEADS, num_classes=NUM_CLASSES))
    logits = fwd(packed, x_svd, x_ent)
    jax.block_until_ready(logits)

    ref = reference_forward(params, x_svd, x_ent, num_heads=HEADS)
    assert logits.shape == (B, NUM_CLASSES)
    # bf16 MXU operands (f32 accumulate) vs f32 reference: allow ~2e-2 slack.
    assert jnp.allclose(logits, ref, rtol=2e-2, atol=2e-2), (logits, ref)
    print("KERNEL_OK")
</pallas_src>

<mosaic_0001>
module attributes {stable_mosaic.version = 11 : i64} {
  func.func @_fused_kernel(%arg0: memref<512x64xbf16, #tpu.memory_space<vmem>>, %arg1: memref<2x512xbf16, #tpu.memory_space<vmem>>, %arg2: memref<192x384xbf16, #tpu.memory_space<vmem>>, %arg3: memref<512x128xbf16, #tpu.memory_space<vmem>>, %arg4: memref<16x384xf32, #tpu.memory_space<vmem>>, %arg5: memref<2x128xf32, #tpu.memory_space<vmem>>) attributes {dimension_semantics = [], scalar_prefetch = 0 : i64, scratch_operands = 0 : i64, tpu.core_type = #tpu.core_type<tc>} {
    %c0 = arith.constant 0 : index
    %c0_0 = arith.constant 0 : index
    %0 = vector.load %arg0[%c0, %c0_0] : memref<512x64xbf16, #tpu.memory_space<vmem>>, vector<512x64xbf16>
    %c0_1 = arith.constant 0 : index
    %c0_2 = arith.constant 0 : index
    %1 = vector.load %arg2[%c0_1, %c0_2] : memref<192x384xbf16, #tpu.memory_space<vmem>>, vector<64x256xbf16>
    %cst = arith.constant dense<0.000000e+00> : vector<512x256xf32>
    %2 = tpu.matmul %0, %1, %cst {dimension_numbers = #tpu.dot_dimension_numbers<[1], [0], [0], [1], [0, 0, 1, 1], [], []>} : vector<512x64xbf16>, vector<64x256xbf16>, vector<512x256xf32> -> vector<512x256xf32>
    %c0_3 = arith.constant 0 : index
    %c0_4 = arith.constant 0 : index
    %3 = vector.load %arg4[%c0_3, %c0_4] : memref<16x384xf32, #tpu.memory_space<vmem>>, vector<1x256xf32>
    %4 = vector.broadcast %3 : vector<1x256xf32> to vector<512x256xf32>
    %5 = arith.addf %2, %4 : vector<512x256xf32>
    %cst_5 = arith.constant 0.000000e+00 : f32
    %6 = vector.broadcast %cst_5 : f32 to vector<512x256xf32>
    %7 = arith.maximumf %5, %6 : vector<512x256xf32>
    %c0_6 = arith.constant 0 : index
    %c0_7 = arith.constant 0 : index
    %8 = vector.load %arg1[%c0_6, %c0_7] : memref<2x512xbf16, #tpu.memory_space<vmem>>, vector<2x512xbf16>
    %9 = arith.truncf %7 : vector<512x256xf32> to vector<512x256xbf16>
    %cst_8 = arith.constant dense<0.000000e+00> : vector<2x256xf32>
    %10 = tpu.matmul %8, %9, %cst_8 {dimension_numbers = #tpu.dot_dimension_numbers<[1], [0], [0], [1], [0, 0, 1, 1], [], []>} : vector<2x512xbf16>, vector<512x256xbf16>, vector<2x256xf32> -> vector<2x256xf32>
    %11 = vector.extract_strided_slice %10 {offsets = [0, 0], sizes = [2, 128], strides = [1, 1]} : vector<2x256xf32> to vector<2x128xf32>
    %12 = vector.extract_strided_slice %10 {offsets = [0, 128], sizes = [2, 128], strides = [1, 1]} : vector<2x256xf32> to vector<2x128xf32>
    %c64 = arith.constant 64 : index
    %c0_9 = arith.constant 0 : index
    %13 = vector.load %arg2[%c64, %c0_9] : memref<192x384xbf16, #tpu.memory_space<vmem>>, vector<128x384xbf16>
    %c1 = arith.constant 1 : index
    %c0_10 = arith.constant 0 : index
    %14 = vector.load %arg4[%c1, %c0_10] : memref<16x384xf32, #tpu.memory_space<vmem>>, vector<1x384xf32>
    %15 = arith.truncf %11 : vector<2x128xf32> to vector<2x128xbf16>
    %cst_11 = arith.constant dense<0.000000e+00> : vector<2x384xf32>
    %16 = tpu.matmul %15, %13, %cst_11 {dimension_numbers = #tpu.dot_dimension_numbers<[1], [0], [0], [1], [0, 0, 1, 1], [], []>} : vector<2x128xbf16>, vector<128x384xbf16>, vector<2x384xf32> -> vector<2x384xf32>
    %17 = vector.broadcast %14 : vector<1x384xf32> to vector<2x384xf32>
    %18 = arith.addf %16, %17 : vector<2x384xf32>
    %19 = arith.truncf %12 : vector<2x128xf32> to vector<2x128xbf16>
    %cst_12 = arith.constant dense<0.000000e+00> : vector<2x384xf32>
    %20 = tpu.matmul %19, %13, %cst_12 {dimension_numbers = #tpu.dot_dimension_numbers<[1], [0], [0], [1], [0, 0, 1, 1], [], []>} : vector<2x128xbf16>, vector<128x384xbf16>, vector<2x384xf32> -> vector<2x384xf32>
    %21 = vector.broadcast %14 : vector<1x384xf32> to vector<2x384xf32>
    %22 = arith.addf %20, %21 : vector<2x384xf32>
    %23 = vector.extract_strided_slice %18 {offsets = [0, 0], sizes = [2, 128], strides = [1, 1]} : vector<2x384xf32> to vector<2x128xf32>
    %24 = vector.extract_strided_slice %18 {offsets = [0, 128], sizes = [2, 128], strides = [1, 1]} : vector<2x384xf32> to vector<2x128xf32>
    %25 = vector.extract_strided_slice %18 {offsets = [0, 256], sizes = [2, 128], strides = [1, 1]} : vector<2x384xf32> to vector<2x128xf32>
    %26 = vector.extract_strided_slice %22 {offsets = [0, 0], sizes = [2, 128], strides = [1, 1]} : vector<2x384xf32> to vector<2x128xf32>
    %27 = vector.extract_strided_slice %22 {offsets = [0, 128], sizes = [2, 128], strides = [1, 1]} : vector<2x384xf32> to vector<2x128xf32>
    %28 = vector.extract_strided_slice %22 {offsets = [0, 256], sizes = [2, 128], strides = [1, 1]} : vector<2x384xf32> to vector<2x128xf32>
    %29 = arith.subf %27, %24 : vector<2x128xf32>
    %30 = arith.subf %28, %25 : vector<2x128xf32>
    %c128 = arith.constant 128 : index
    %c0_13 = arith.constant 0 : index
    %31 = vector.load %arg3[%c128, %c0_13] : memref<512x128xbf16, #tpu.memory_space<vmem>>, vector<128x128xbf16>
    %32 = arith.mulf %23, %29 : vector<2x128xf32>
    %33 = arith.truncf %32 : vector<2x128xf32> to vector<2x128xbf16>
    %cst_14 = arith.constant dense<0.000000e+00> : vector<2x128xf32>
    %34 = tpu.matmul %33, %31, %cst_14 {dimension_numbers = #tpu.dot_dimension_numbers<[1], [0], [0], [1], [0, 0, 1, 1], [], []>} : vector<2x128xbf16>, vector<128x128xbf16>, vector<2x128xf32> -> vector<2x128xf32>
    %35 = arith.mulf %26, %29 : vector<2x128xf32>
    %36 = arith.truncf %35 : vector<2x128xf32> to vector<2x128xbf16>
    %cst_15 = arith.constant dense<0.000000e+00> : vector<2x128xf32>
    %37 = tpu.matmul %36, %31, %cst_15 {dimension_numbers = #tpu.dot_dimension_numbers<[1], [0], [0], [1], [0, 0, 1, 1], [], []>} : vector<2x128xbf16>, vector<128x128xbf16>, vector<2x128xf32> -> vector<2x128xf32>
    %cst_16 = arith.constant -0.353553385 : f32
    %38 = vector.broadcast %cst_16 : f32 to vector<2x128xf32>
    %39 = arith.mulf %38, %34 : vector<2x128xf32>
    %40 = math.exp %39 : vector<2x128xf32>
    %cst_17 = arith.constant 1.000000e+00 : f32
    %41 = vector.broadcast %cst_17 : f32 to vector<2x128xf32>
    %42 = arith.addf %41, %40 : vector<2x128xf32>
    %cst_18 = arith.constant 1.000000e+00 : f32
    %43 = vector.broadcast %cst_18 : f32 to vector<2x128xf32>
    %44 = arith.divf %43, %42 : vector<2x128xf32>
    %cst_19 = arith.constant 0.353553385 : f32
    %45 = vector.broadcast %cst_19 : f32 to vector<2x128xf32>
    %46 = arith.mulf %45, %37 : vector<2x128xf32>
    %47 = math.exp %46 : vector<2x128xf32>
    %cst_20 = arith.constant 1.000000e+00 : f32
    %48 = vector.broadcast %cst_20 : f32 to vector<2x128xf32>
    %49 = arith.addf %48, %47 : vector<2x128xf32>
    %cst_21 = arith.constant 1.000000e+00 : f32
    %50 = vector.broadcast %cst_21 : f32 to vector<2x128xf32>
    %51 = arith.divf %50, %49 : vector<2x128xf32>
    %c384 = arith.constant 384 : index
    %c0_22 = arith.constant 0 : index
    %52 = vector.load %arg3[%c384, %c0_22] : memref<512x128xbf16, #tpu.memory_space<vmem>>, vector<128x128xbf16>
    %53 = arith.truncf %44 : vector<2x128xf32> to vector<2x128xbf16>
    %cst_23 = arith.constant dense<0.000000e+00> : vector<2x128xf32>
    %54 = tpu.matmul %53, %52, %cst_23 {dimension_numbers = #tpu.dot_dimension_numbers<[1], [0], [0], [1], [0, 0, 1, 1], [], []>} : vector<2x128xbf16>, vector<128x128xbf16>, vector<2x128xf32> -> vector<2x128xf32>
    %55 = arith.truncf %51 : vector<2x128xf32> to vector<2x128xbf16>
    %cst_24 = arith.constant dense<0.000000e+00> : vector<2x128xf32>
    %56 = tpu.matmul %55, %52, %cst_24 {dimension_numbers = #tpu.dot_dimension_numbers<[1], [0], [0], [1], [0, 0, 1, 1], [], []>} : vector<2x128xbf16>, vector<128x128xbf16>, vector<2x128xf32> -> vector<2x128xf32>
    %57 = arith.mulf %54, %30 : vector<2x128xf32>
    %58 = arith.addf %25, %57 : vector<2x128xf32>
    %59 = arith.mulf %56, %30 : vector<2x128xf32>
    %60 = arith.subf %28, %59 : vector<2x128xf32>
    %c0_25 = arith.constant 0 : index
    %c0_26 = arith.constant 0 : index
    %61 = vector.load %arg3[%c0_25, %c0_26] : memref<512x128xbf16, #tpu.memory_space<vmem>>, vector<128x128xbf16>
    %c2 = arith.constant 2 : index
    %c0_27 = arith.constant 0 : index
    %62 = vector.load %arg4[%c2, %c0_27] : memref<16x384xf32, #tpu.memory_space<vmem>>, vector<1x128xf32>
    %63 = arith.truncf %58 : vector<2x128xf32> to vector<2x128xbf16>
    %cst_28 = arith.constant dense<0.000000e+00> : vector<2x128xf32>
    %64 = tpu.matmul %63, %61, %cst_28 {dimension_numbers = #tpu.dot_dimension_numbers<[1], [0], [0], [1], [0, 0, 1, 1], [], []>} : vector<2x128xbf16>, vector<128x128xbf16>, vector<2x128xf32> -> vector<2x128xf32>
    %65 = vector.broadcast %62 : vector<1x128xf32> to vector<2x128xf32>
    %66 = arith.addf %64, %65 : vector<2x128xf32>
    %67 = arith.truncf %60 : vector<2x128xf32> to vector<2x128xbf16>
    %cst_29 = arith.constant dense<0.000000e+00> : vector<2x128xf32>
    %68 = tpu.matmul %67, %61, %cst_29 {dimension_numbers = #tpu.dot_dimension_numbers<[1], [0], [0], [1], [0, 0, 1, 1], [], []>} : vector<2x128xbf16>, vector<128x128xbf16>, vector<2x128xf32> -> vector<2x128xf32>
    %69 = vector.broadcast %62 : vector<1x128xf32> to vector<2x128xf32>
    %70 = arith.addf %68, %69 : vector<2x128xf32>
    %c3 = arith.constant 3 : index
    %c0_30 = arith.constant 0 : index
    %71 = vector.load %arg4[%c3, %c0_30] : memref<16x384xf32, #tpu.memory_space<vmem>>, vector<1x128xf32>
    %c4 = arith.constant 4 : index
    %c0_31 = arith.constant 0 : index
    %72 = vector.load %arg4[%c4, %c0_31] : memref<16x384xf32, #tpu.memory_space<vmem>>, vector<1x128xf32>
    %73 = arith.addf %11, %66 : vector<2x128xf32>
    %cst_32 = arith.constant dense<0.000000e+00> : vector<2xf32>
    %74 = vector.multi_reduction <add>, %73, %cst_32 [1] : vector<2x128xf32> to vector<2xf32>
    %75 = vector.shape_cast %74 : vector<2xf32> to vector<2x1xf32>
    %76 = arith.mulf %73, %73 : vector<2x128xf32>
    %cst_33 = arith.constant dense<0.000000e+00> : vector<2xf32>
    %77 = vector.multi_reduction <add>, %76, %cst_33 [1] : vector<2x128xf32> to vector<2xf32>
    %78 = vector.shape_cast %77 : vector<2xf32> to vector<2x1xf32>
    %cst_34 = arith.constant 3.125000e-02 : f32
    %79 = vector.broadcast %cst_34 : f32 to vector<2x1xf32>
    %80 = arith.mulf %75, %79 : vector<2x1xf32>
    %cst_35 = arith.constant 3.125000e-02 : f32
    %81 = vector.broadcast %cst_35 : f32 to vector<2x1xf32>
    %82 = arith.mulf %78, %81 : vector<2x1xf32>
    %83 = arith.mulf %80, %80 : vector<2x1xf32>
    %84 = arith.subf %82, %83 : vector<2x1xf32>
    %85 = vector.broadcast %80 : vector<2x1xf32> to vector<2x128xf32>
    %86 = arith.subf %73, %85 : vector<2x128xf32>
    %cst_36 = arith.constant 9.99999974E-6 : f32
    %87 = vector.broadcast %cst_36 : f32 to vector<2x1xf32>
    %88 = arith.addf %84, %87 : vector<2x1xf32>
    %89 = math.rsqrt %88 : vector<2x1xf32>
    %90 = vector.broadcast %89 : vector<2x1xf32> to vector<2x128xf32>
    %91 = arith.mulf %86, %90 : vector<2x128xf32>
    %92 = vector.broadcast %71 : vector<1x128xf32> to vector<2x128xf32>
    %93 = arith.mulf %91, %92 : vector<2x128xf32>
    %94 = vector.broadcast %72 : vector<1x128xf32> to vector<2x128xf32>
    %95 = arith.addf %93, %94 : vector<2x128xf32>
    %96 = arith.addf %12, %70 : vector<2x128xf32>
    %cst_37 = arith.constant dense<0.000000e+00> : vector<2xf32>
    %97 = vector.multi_reduction <add>, %96, %cst_37 [1] : vector<2x128xf32> to vector<2xf32>
    %98 = vector.shape_cast %97 : vector<2xf32> to vector<2x1xf32>
    %99 = arith.mulf %96, %96 : vector<2x128xf32>
    %cst_38 = arith.constant dense<0.000000e+00> : vector<2xf32>
    %100 = vector.multi_reduction <add>, %99, %cst_38 [1] : vector<2x128xf32> to vector<2xf32>
    %101 = vector.shape_cast %100 : vector<2xf32> to vector<2x1xf32>
    %cst_39 = arith.constant 3.125000e-02 : f32
    %102 = vector.broadcast %cst_39 : f32 to vector<2x1xf32>
    %103 = arith.mulf %98, %102 : vector<2x1xf32>
    %cst_40 = arith.constant 3.125000e-02 : f32
    %104 = vector.broadcast %cst_40 : f32 to vector<2x1xf32>
    %105 = arith.mulf %101, %104 : vector<2x1xf32>
    %106 = arith.mulf %103, %103 : vector<2x1xf32>
    %107 = arith.subf %105, %106 : vector<2x1xf32>
    %108 = vector.broadcast %103 : vector<2x1xf32> to vector<2x128xf32>
    %109 = arith.subf %96, %108 : vector<2x128xf32>
    %cst_41 = arith.constant 9.99999974E-6 : f32
    %110 = vector.broadcast %cst_41 : f32 to vector<2x1xf32>
    %111 = arith.addf %107, %110 : vector<2x1xf32>
    %112 = math.rsqrt %111 : vector<2x1xf32>
    %113 = vector.broadcast %112 : vector<2x1xf32> to vector<2x128xf32>
    %114 = arith.mulf %109, %113 : vector<2x128xf32>
    %115 = vector.broadcast %71 : vector<1x128xf32> to vector<2x128xf32>
    %116 = arith.mulf %114, %115 : vector<2x128xf32>
    %117 = vector.broadcast %72 : vector<1x128xf32> to vector<2x128xf32>
    %118 = arith.addf %116, %117 : vector<2x128xf32>
    %c5 = arith.constant 5 : index
    %c0_42 = arith.constant 0 : index
    %119 = vector.load %arg4[%c5, %c0_42] : memref<16x384xf32, #tpu.memory_space<vmem>>, vector<1x128xf32>
    %c6 = arith.constant 6 : index
    %c0_43 = arith.constant 0 : index
    %120 = vector.load %arg4[%c6, %c0_43] : memref<16x384xf32, #tpu.memory_space<vmem>>, vector<1x128xf32>
    %c256 = arith.constant 256 : index
    %c0_44 = arith.constant 0 : index
    %121 = vector.load %arg3[%c256, %c0_44] : memref<512x128xbf16, #tpu.memory_space<vmem>>, vector<128x128xbf16>
    %122 = arith.truncf %95 : vector<2x128xf32> to vector<2x128xbf16>
    %cst_45 = arith.constant dense<0.000000e+00> : vector<2x128xf32>
    %123 = tpu.matmul %122, %31, %cst_45 {dimension_numbers = #tpu.dot_dimension_numbers<[1], [0], [0], [1], [0, 0, 1, 1], [], []>} : vector<2x128xbf16>, vector<128x128xbf16>, vector<2x128xf32> -> vector<2x128xf32>
    %124 = vector.broadcast %119 : vector<1x128xf32> to vector<2x128xf32>
    %125 = arith.addf %123, %124 : vector<2x128xf32>
    %cst_46 = arith.constant 5.000000e-01 : f32
    %126 = vector.broadcast %cst_46 : f32 to vector<2x128xf32>
    %127 = arith.mulf %126, %125 : vector<2x128xf32>
    %cst_47 = arith.constant 0.707106769 : f32
    %128 = vector.broadcast %cst_47 : f32 to vector<2x128xf32>
    %129 = arith.mulf %125, %128 : vector<2x128xf32>
    %cst_48 = arith.constant 0.000000e+00 : f32
    %130 = vector.broadcast %cst_48 : f32 to vector<2x128xf32>
    %131 = arith.cmpf oge, %129, %130 : vector<2x128xf32>
    %cst_49 = arith.constant 1.000000e+00 : f32
    %cst_50 = arith.constant -1.000000e+00 : f32
    %132 = vector.broadcast %cst_49 : f32 to vector<2x128xf32>
    %133 = vector.broadcast %cst_50 : f32 to vector<2x128xf32>
    %134 = arith.select %131, %132, %133 : vector<2x128xi1>, vector<2x128xf32>
    %135 = math.absf %129 : vector<2x128xf32>
    %cst_51 = arith.constant 0.327591091 : f32
    %136 = vector.broadcast %cst_51 : f32 to vector<2x128xf32>
    %137 = arith.mulf %136, %135 : vector<2x128xf32>
    %cst_52 = arith.constant 1.000000e+00 : f32
    %138 = vector.broadcast %cst_52 : f32 to vector<2x128xf32>
    %139 = arith.addf %138, %137 : vector<2x128xf32>
    %cst_53 = arith.constant 1.000000e+00 : f32
    %140 = vector.broadcast %cst_53 : f32 to vector<2x128xf32>
    %141 = arith.divf %140, %139 : vector<2x128xf32>
    %cst_54 = arith.constant 1.06140542 : f32
    %142 = vector.broadcast %cst_54 : f32 to vector<2x128xf32>
    %143 = arith.mulf %142, %141 : vector<2x128xf32>
    %cst_55 = arith.constant -1.45315206 : f32
    %144 = vector.broadcast %cst_55 : f32 to vector<2x128xf32>
    %145 = arith.addf %143, %144 : vector<2x128xf32>
    %146 = arith.mulf %145, %141 : vector<2x128xf32>
    %cst_56 = arith.constant 1.42141378 : f32
    %147 = vector.broadcast %cst_56 : f32 to vector<2x128xf32>
    %148 = arith.addf %146, %147 : vector<2x128xf32>
    %149 = arith.mulf %148, %141 : vector<2x128xf32>
    %cst_57 = arith.constant -0.284496725 : f32
    %150 = vector.broadcast %cst_57 : f32 to vector<2x128xf32>
    %151 = arith.addf %149, %150 : vector<2x128xf32>
    %152 = arith.mulf %151, %141 : vector<2x128xf32>
    %cst_58 = arith.constant 0.254829586 : f32
    %153 = vector.broadcast %cst_58 : f32 to vector<2x128xf32>
    %154 = arith.addf %152, %153 : vector<2x128xf32>
    %155 = arith.mulf %154, %141 : vector<2x128xf32>
    %cst_59 = arith.constant 0.000000e+00 : f32
    %156 = vector.broadcast %cst_59 : f32 to vector<2x128xf32>
    %157 = arith.subf %156, %135 : vector<2x128xf32>
    %158 = arith.mulf %157, %135 : vector<2x128xf32>
    %159 = math.exp %158 : vector<2x128xf32>
    %160 = arith.mulf %155, %159 : vector<2x128xf32>
    %cst_60 = arith.constant 1.000000e+00 : f32
    %161 = vector.broadcast %cst_60 : f32 to vector<2x128xf32>
    %162 = arith.subf %161, %160 : vector<2x128xf32>
    %163 = arith.mulf %134, %162 : vector<2x128xf32>
    %cst_61 = arith.constant 1.000000e+00 : f32
    %164 = vector.broadcast %cst_61 : f32 to vector<2x128xf32>
    %165 = arith.addf %164, %163 : vector<2x128xf32>
    %166 = arith.mulf %127, %165 : vector<2x128xf32>
    %167 = arith.truncf %166 : vector<2x128xf32> to vector<2x128xbf16>
    %cst_62 = arith.constant dense<0.000000e+00> : vector<2x128xf32>
    %168 = tpu.matmul %167, %121, %cst_62 {dimension_numbers = #tpu.dot_dimension_numbers<[1], [0], [0], [1], [0, 0, 1, 1], [], []>} : vector<2x128xbf16>, vector<128x128xbf16>, vector<2x128xf32> -> vector<2x128xf32>
    %169 = arith.addf %95, %168 : vector<2x128xf32>
    %170 = vector.broadcast %120 : vector<1x128xf32> to vector<2x128xf32>
    %171 = arith.addf %169, %170 : vector<2x128xf32>
    %172 = arith.truncf %118 : vector<2x128xf32> to vector<2x128xbf16>
    %cst_63 = arith.constant dense<0.000000e+00> : vector<2x128xf32>
    %173 = tpu.matmul %172, %31, %cst_63 {dimension_numbers = #tpu.dot_dimension_numbers<[1], [0], [0], [1], [0, 0, 1, 1], [], []>} : vector<2x128xbf16>, vector<128x128xbf16>, vector<2x128xf32> -> vector<2x128xf32>
    %174 = vector.broadcast %119 : vector<1x128xf32> to vector<2x128xf32>
    %175 = arith.addf %173, %174 : vector<2x128xf32>
    %cst_64 = arith.constant 5.000000e-01 : f32
    %176 = vector.broadcast %cst_64 : f32 to vector<2x128xf32>
    %177 = arith.mulf %176, %175 : vector<2x128xf32>
    %cst_65 = arith.constant 0.707106769 : f32
    %178 = vector.broadcast %cst_65 : f32 to vector<2x128xf32>
    %179 = arith.mulf %175, %178 : vector<2x128xf32>
    %cst_66 = arith.constant 0.000000e+00 : f32
    %180 = vector.broadcast %cst_66 : f32 to vector<2x128xf32>
    %181 = arith.cmpf oge, %179, %180 : vector<2x128xf32>
    %cst_67 = arith.constant 1.000000e+00 : f32
    %cst_68 = arith.constant -1.000000e+00 : f32
    %182 = vector.broadcast %cst_67 : f32 to vector<2x128xf32>
    %183 = vector.broadcast %cst_68 : f32 to vector<2x128xf32>
    %184 = arith.select %181, %182, %183 : vector<2x128xi1>, vector<2x128xf32>
    %185 = math.absf %179 : vector<2x128xf32>
    %cst_69 = arith.constant 0.327591091 : f32
    %186 = vector.broadcast %cst_69 : f32 to vector<2x128xf32>
    %187 = arith.mulf %186, %185 : vector<2x128xf32>
    %cst_70 = arith.constant 1.000000e+00 : f32
    %188 = vector.broadcast %cst_70 : f32 to vector<2x128xf32>
    %189 = arith.addf %188, %187 : vector<2x128xf32>
    %cst_71 = arith.constant 1.000000e+00 : f32
    %190 = vector.broadcast %cst_71 : f32 to vector<2x128xf32>
    %191 = arith.divf %190, %189 : vector<2x128xf32>
    %cst_72 = arith.constant 1.06140542 : f32
    %192 = vector.broadcast %cst_72 : f32 to vector<2x128xf32>
    %193 = arith.mulf %192, %191 : vector<2x128xf32>
    %cst_73 = arith.constant -1.45315206 : f32
    %194 = vector.broadcast %cst_73 : f32 to vector<2x128xf32>
    %195 = arith.addf %193, %194 : vector<2x128xf32>
    %196 = arith.mulf %195, %191 : vector<2x128xf32>
    %cst_74 = arith.constant 1.42141378 : f32
    %197 = vector.broadcast %cst_74 : f32 to vector<2x128xf32>
    %198 = arith.addf %196, %197 : vector<2x128xf32>
    %199 = arith.mulf %198, %191 : vector<2x128xf32>
    %cst_75 = arith.constant -0.284496725 : f32
    %200 = vector.broadcast %cst_75 : f32 to vector<2x128xf32>
    %201 = arith.addf %199, %200 : vector<2x128xf32>
    %202 = arith.mulf %201, %191 : vector<2x128xf32>
    %cst_76 = arith.constant 0.254829586 : f32
    %203 = vector.broadcast %cst_76 : f32 to vector<2x128xf32>
    %204 = arith.addf %202, %203 : vector<2x128xf32>
    %205 = arith.mulf %204, %191 : vector<2x128xf32>
    %cst_77 = arith.constant 0.000000e+00 : f32
    %206 = vector.broadcast %cst_77 : f32 to vector<2x128xf32>
    %207 = arith.subf %206, %185 : vector<2x128xf32>
    %208 = arith.mulf %207, %185 : vector<2x128xf32>
    %209 = math.exp %208 : vector<2x128xf32>
    %210 = arith.mulf %205, %209 : vector<2x128xf32>
    %cst_78 = arith.constant 1.000000e+00 : f32
    %211 = vector.broadcast %cst_78 : f32 to vector<2x128xf32>
    %212 = arith.subf %211, %210 : vector<2x128xf32>
    %213 = arith.mulf %184, %212 : vector<2x128xf32>
    %cst_79 = arith.constant 1.000000e+00 : f32
    %214 = vector.broadcast %cst_79 : f32 to vector<2x128xf32>
    %215 = arith.addf %214, %213 : vector<2x128xf32>
    %216 = arith.mulf %177, %215 : vector<2x128xf32>
    %217 = arith.truncf %216 : vector<2x128xf32> to vector<2x128xbf16>
    %cst_80 = arith.constant dense<0.000000e+00> : vector<2x128xf32>
    %218 = tpu.matmul %217, %121, %cst_80 {dimension_numbers = #tpu.dot_dimension_numbers<[1], [0], [0], [1], [0, 0, 1, 1], [], []>} : vector<2x128xbf16>, vector<128x128xbf16>, vector<2x128xf32> -> vector<2x128xf32>
    %219 = arith.addf %118, %218 : vector<2x128xf32>
    %220 = vector.broadcast %120 : vector<1x128xf32> to vector<2x128xf32>
    %221 = arith.addf %219, %220 : vector<2x128xf32>
    %222 = arith.addf %171, %221 : vector<2x128xf32>
    %cst_81 = arith.constant 5.000000e-01 : f32
    %223 = vector.broadcast %cst_81 : f32 to vector<2x128xf32>
    %224 = arith.mulf %223, %222 : vector<2x128xf32>
    %c7 = arith.constant 7 : index
    %c0_82 = arith.constant 0 : index
    %225 = vector.load %arg4[%c7, %c0_82] : memref<16x384xf32, #tpu.memory_space<vmem>>, vector<1x128xf32>
    %c8 = arith.constant 8 : index
    %c0_83 = arith.constant 0 : index
    %226 = vector.load %arg4[%c8, %c0_83] : memref<16x384xf32, #tpu.memory_space<vmem>>, vector<1x128xf32>
    %cst_84 = arith.constant dense<0.000000e+00> : vector<2xf32>
    %227 = vector.multi_reduction <add>, %224, %cst_84 [1] : vector<2x128xf32> to vector<2xf32>
    %228 = vector.shape_cast %227 : vector<2xf32> to vector<2x1xf32>
    %229 = arith.mulf %224, %224 : vector<2x128xf32>
    %cst_85 = arith.constant dense<0.000000e+00> : vector<2xf32>
    %230 = vector.multi_reduction <add>, %229, %cst_85 [1] : vector<2x128xf32> to vector<2xf32>
    %231 = vector.shape_cast %230 : vector<2xf32> to vector<2x1xf32>
    %cst_86 = arith.constant 3.125000e-02 : f32
    %232 = vector.broadcast %cst_86 : f32 to vector<2x1xf32>
    %233 = arith.mulf %228, %232 : vector<2x1xf32>
    %cst_87 = arith.constant 3.125000e-02 : f32
    %234 = vector.broadcast %cst_87 : f32 to vector<2x1xf32>
    %235 = arith.mulf %231, %234 : vector<2x1xf32>
    %236 = arith.mulf %233, %233 : vector<2x1xf32>
    %237 = arith.subf %235, %236 : vector<2x1xf32>
    %238 = vector.broadcast %233 : vector<2x1xf32> to vector<2x128xf32>
    %239 = arith.subf %224, %238 : vector<2x128xf32>
    %cst_88 = arith.constant 9.99999974E-6 : f32
    %240 = vector.broadcast %cst_88 : f32 to vector<2x1xf32>
    %241 = arith.addf %237, %240 : vector<2x1xf32>
    %242 = math.rsqrt %241 : vector<2x1xf32>
    %243 = vector.broadcast %242 : vector<2x1xf32> to vector<2x128xf32>
    %244 = arith.mulf %239, %243 : vector<2x128xf32>
    %245 = vector.broadcast %225 : vector<1x128xf32> to vector<2x128xf32>
    %246 = arith.mulf %244, %245 : vector<2x128xf32>
    %247 = vector.broadcast %226 : vector<1x128xf32> to vector<2x128xf32>
    %248 = arith.addf %246, %247 : vector<2x128xf32>
    %249 = arith.truncf %248 : vector<2x128xf32> to vector<2x128xbf16>
    %cst_89 = arith.constant dense<0.000000e+00> : vector<2x128xf32>
    %250 = tpu.matmul %249, %31, %cst_89 {dimension_numbers = #tpu.dot_dimension_numbers<[1], [0], [0], [1], [0, 0, 1, 1], [], []>} : vector<2x128xbf16>, vector<128x128xbf16>, vector<2x128xf32> -> vector<2x128xf32>
    %c9 = arith.constant 9 : index
    %c0_90 = arith.constant 0 : index
    %251 = vector.load %arg4[%c9, %c0_90] : memref<16x384xf32, #tpu.memory_space<vmem>>, vector<1x128xf32>
    %252 = vector.broadcast %251 : vector<1x128xf32> to vector<2x128xf32>
    %253 = arith.addf %250, %252 : vector<2x128xf32>
    %c0_91 = arith.constant 0 : index
    %c0_92 = arith.constant 0 : index
    %254 = vector.load %arg5[%c0_91, %c0_92] : memref<2x128xf32, #tpu.memory_space<vmem>>, vector<2x128xf32>
    tpu.vector_store %arg5[%c0_91, %c0_92], %253 {strides = array<i32>} : memref<2x128xf32, #tpu.memory_space<vmem>>, vector<2x128xf32>,
    return
  }
}

</mosaic_0001>

<bundles_post_ra>
// kernel: dual_branch_forward.1
= control target key start
LH: loop header
LB: loop body
LE: loop exit
PB: predicated region body
PF: predicated region fallthrough
CT: control target
= control target key end

     0   :  { %v2909_v1 = vmov 0   ;;  %vm305_vm0 = vcmask 523264   ;;  %v95_v35 = vlaneseq  ;;  %v2910_v49 = vmov 1966171168   ;;  %s3803_s2 = inlined_call_operand.vmem [shape: bf16[192,384], index: 2, kind: input, shape index: {}]   ;;  %s3804_s0 = inlined_call_operand.vmem [shape: bf16[512,64], index: 0, kind: input, shape index: {}]   ;;  %s3805_s4 = inlined_call_operand.vmem [shape: f32[16,384], index: 4, kind: input, shape index: {}]   ;;  %s3806_s1 = inlined_call_operand.vmem [shape: bf16[2,512], index: 1, kind: input, shape index: {}]   ;;  %s3807_s3 = inlined_call_operand.vmem [shape: bf16[512,128], index: 3, kind: input, shape index: {}]   ;;  %s3808_s5 = inlined_call_operand.vmem [shape: f32[2,128], index: 5, kind: output, shape index: {}]  }
   0x1   :  { %v2779_v0 = vld [vmem:[%s3803_s2 + $0x4] ss:$12 sps:$4 sm:$0xff]   ;;  %434 = vmatprep.mubr.bf16.mxu0 %v2909_v1  ;;  %v2781_v2 = vld [vmem:[%s3803_s2] ss:$12 sps:$4 sm:$0xff]   ;;  %v2782_v3 = vld [vmem:[%s3803_s2 + $0x1c] ss:$12 sps:$4 sm:$0xff]   ;;  %v958_v50 = vunpack.c.l.s4 %v2910_v49 }
   0x2   :  { %402 = vmatprep.subr.bf16.mxu0 %v2779_v0  ;;  %v2784_v4 = vld [vmem:[%s3803_s2 + $0x18] ss:$12 sps:$4 sm:$0xff]   ;;  %v2785_v5 = vld [vmem:[%s3803_s2 + $0x34] ss:$12 sps:$4 sm:$0xff]   ;;  %v2787_v6 = vld [vmem:[%s3803_s2 + $0x30] ss:$12 sps:$4 sm:$0xff]  }
   0x3   :  { %403 = vmatpush1.bf16.msra.mxu0 %v2781_v2  ;;  %v2788_v7 = vld [vmem:[%s3803_s2 + $0x4c] ss:$12 sps:$4 sm:$0xff]   ;;  %v2790_v8 = vld [vmem:[%s3803_s2 + $0x48] ss:$12 sps:$4 sm:$0xff]   ;;  %v2791_v9 = vld [vmem:[%s3804_s0] sm:$0xff]   ;;  %v3098_v36 = vshrl.u32 %v95_v35, 7  ;;  %v959_v54 = vunpack.c.0.s8 %v958_v50 }
   0x4   :  { %404 = vmatprep.subr.bf16.mxu0 %v2782_v3  ;;  %v2792_v10 = vld [vmem:[%s3804_s0 + $0x8] sm:$0xff]   ;;  %v2793_v11 = vld [vmem:[%s3804_s0 + $0x10] sm:$0xff]   ;;  %v2794_v12 = vld [vmem:[%s3804_s0 + $0x18] sm:$0xff]   ;;  %vm2912_vm1 = vmmov 0   ;;  %vm1863_vm2 = vcmask 1041408  }
   0x5   :  { %v2795_v13 = vld [vmem:[%s3804_s0 + $0x20] sm:$0xff]   ;;  %v2796_v14 = vld [vmem:[%s3804_s0 + $0x28] sm:$0xff]   ;;  %v2797_v15 = vld [vmem:[%s3804_s0 + $0x30] sm:$0xff]   ;;  %v97_v38 = vsub.s32 0, %v3098_v36  ;;  %v101_v40 = vsub.s32 1, %v3098_v36  ;;  %v962_v61 = vsub.s32 %v959_v54, %v3098_v36 }
   0x6   :  { %v2798_v16 = vld [vmem:[%s3804_s0 + $0x38] sm:$0xff]   ;;  %v2799_v17 = vld [vmem:[%s3804_s0 + $0x40] sm:$0xff]   ;;  %v2800_v18 = vld [vmem:[%s3804_s0 + $0x48] sm:$0xff]  }
   0x7   :  { %405 = vmatpush1.bf16.msra.mxu0 %v2784_v4  ;;  %v2801_v19 = vld [vmem:[%s3804_s0 + $0x50] sm:$0xff]   ;;  %v2802_v20 = vld [vmem:[%s3804_s0 + $0x58] sm:$0xff]   ;;  %v2803_v21 = vld [vmem:[%s3804_s0 + $0x60] sm:$0xff]  }
   0x8   :  { %406 = vmatprep.subr.bf16.mxu0 %v2785_v5  ;;  %v2804_v22 = vld [vmem:[%s3804_s0 + $0x68] sm:$0xff]   ;;  %v2805_v23 = vld [vmem:[%s3804_s0 + $0x70] sm:$0xff]   ;;  %v2806_v24 = vld [vmem:[%s3804_s0 + $0x78] sm:$0xff]  }
   0x9   :  { %v2807_v25 = vld [vmem:[%s3804_s0 + $0x80] sm:$0xff]   ;;  %v2808_v26 = vld [vmem:[%s3804_s0 + $0x88] sm:$0xff]   ;;  %v2809_v27 = vld [vmem:[%s3804_s0 + $0x90] sm:$0xff]  }
   0xa   :  { %v2810_v28 = vld [vmem:[%s3804_s0 + $0x98] sm:$0xff]   ;;  %v2811_v29 = vld [vmem:[%s3804_s0 + $0xa0] sm:$0xff]   ;;  %v2812_v30 = vld [vmem:[%s3804_s0 + $0xa8] sm:$0xff]  }
   0xb   :  { %407 = vmatpush1.bf16.msra.mxu0 %v2787_v6  ;;  %v2813_v31 = vld [vmem:[%s3804_s0 + $0xb0] sm:$0xff]   ;;  %v2814_v32 = vld [vmem:[%s3804_s0 + $0xb8] sm:$0xff]   ;;  %v2815_v33 = vld [vmem:[%s3804_s0 + $0xc0] sm:$0xff]  }
   0xc   :  { %408 = vmatprep.subr.bf16.mxu0 %v2788_v7  ;;  %v2816_v34 = vld [vmem:[%s3804_s0 + $0xc8] sm:$0xff]   ;;  %v2817_v37 = vld [vmem:[%s3804_s0 + $0xd0] sm:$0xff]   ;;  %v2818_v46 = vld [vmem:[%s3804_s0 + $0xd8] sm:$0xff]  }
   0xd   :  { %v93_v39 = vld [vmem:[%s3805_s4] ss:$8 sm:$0x3] }
   0xe   :  { %v3112_v41 = vrot.slane %v93_v39, %v97_v38  ;;  %v3116_v42 = vrot.slane %v93_v39, %v101_v40  ;;  %v2327_v57 = vld.sshfl [vmem:[%s3806_s1] sm:$0x33 pattern:$0x75316420] }
   0xf   :  { %409 = vmatpush1.bf16.msra.mxu0 %v2790_v8  ;;  %v956_v60 = vcombine.high %v2327_v57, %v2327_v57  ;;  %v2819_v5 = vld [vmem:[%s3804_s0 + $0xe0] sm:$0xff]   ;;  %v3138_v6 = vrot.slane %v2327_v57, %v962_v61 }
  0x11   :  { %v3132_v2 = vrot.slane %v956_v60, %v962_v61 }
  0x12   :  { %2295 = vmatmul.mubr.msk.bf16.vlgmr.msra.gmra.mrb[0].mxu0 %vm305_vm0, %v2791_v9 }
  0x13   :  { %444 = vmatprep.mubr.bf16.mxu0 %v2909_v1  ;;  %1009 = vmatprep.mubr.bf16.mxu1 %v3132_v2 }
  0x1a   :  { %2296 = vmatmul.mubr.msk.bf16.gmra.mrb[4].mxu0 %vm305_vm0, %v2792_v10 }
  0x1b   :  { %454 = vmatprep.mubr.bf16.mxu0 %v2909_v1 }
  0x22   :  { %2297 = vmatmul.mubr.msk.bf16.gmra.mrb[8].mxu0 %vm305_vm0, %v2793_v11 }
  0x23   :  { %464 = vmatprep.mubr.bf16.mxu0 %v2909_v1 }
  0x2a   :  { %2298 = vmatmul.mubr.msk.bf16.gmra.mrb[12].mxu0 %vm305_vm0, %v2794_v12 }
  0x2b   :  { %474 = vmatprep.mubr.bf16.mxu0 %v2909_v1 }
  0x32   :  { %2299 = vmatmul.mubr.msk.bf16.gmra.mrb[16].mxu0 %vm305_vm0, %v2795_v13 }
  0x33   :  { %484 = vmatprep.mubr.bf16.mxu0 %v2909_v1 }
  0x3a   :  { %2300 = vmatmul.mubr.msk.bf16.gmra.mrb[20].mxu0 %vm305_vm0, %v2796_v14 }
  0x3b   :  { %494 = vmatprep.mubr.bf16.mxu0 %v2909_v1 }
  0x42   :  { %2301 = vmatmul.mubr.msk.bf16.gmra.mrb[24].mxu0 %vm305_vm0, %v2797_v15 }
  0x43   :  { %504 = vmatprep.mubr.bf16.mxu0 %v2909_v1 }
  0x4a   :  { %2302 = vmatmul.mubr.msk.bf16.gmra.mrb[28].mxu0 %vm305_vm0, %v2798_v16 }
  0x4b   :  { %514 = vmatprep.mubr.bf16.mxu0 %v2909_v1 }
  0x52   :  { %2303 = vmatmul.mubr.msk.bf16.gmra.mrb[32].mxu0 %vm305_vm0, %v2799_v17 }
  0x53   :  { %524 = vmatprep.mubr.bf16.mxu0 %v2909_v1 }
  0x5a   :  { %2304 = vmatmul.mubr.msk.bf16.gmra.mrb[36].mxu0 %vm305_vm0, %v2800_v18 }
  0x5b   :  { %534 = vmatprep.mubr.bf16.mxu0 %v2909_v1 }
  0x62   :  { %2305 = vmatmul.mubr.msk.bf16.gmra.mrb[40].mxu0 %vm305_vm0, %v2801_v19 }
  0x63   :  { %544 = vmatprep.mubr.bf16.mxu0 %v2909_v1 }
  0x6a   :  { %2306 = vmatmul.mubr.msk.bf16.gmra.mrb[44].mxu0 %vm305_vm0, %v2802_v20 }
  0x6b   :  { %554 = vmatprep.mubr.bf16.mxu0 %v2909_v1 }
  0x72   :  { %2307 = vmatmul.mubr.msk.bf16.gmra.mrb[48].mxu0 %vm305_vm0, %v2803_v21  ;;  %v2820_v21 = vld [vmem:[%s3804_s0 + $0xe8] sm:$0xff]  }
  0x73   :  { %564 = vmatprep.mubr.bf16.mxu0 %v2909_v1 }
  0x7a   :  { %2308 = vmatmul.mubr.msk.bf16.gmra.mrb[52].mxu0 %vm305_vm0, %v2804_v22 }
  0x7b   :  { %574 = vmatprep.mubr.bf16.mxu0 %v2909_v1 }
  0x82   :  { %2309 = vmatmul.mubr.msk.bf16.gmra.mrb[56].mxu0 %vm305_vm0, %v2805_v23 }
  0x83   :  { %584 = vmatprep.mubr.bf16.mxu0 %v2909_v1 }
  0x8a   :  { %2310 = vmatmul.mubr.msk.bf16.gmra.mrb[60].mxu0 %vm305_vm0, %v2806_v24 }
  0x8b   :  { %594 = vmatprep.mubr.bf16.mxu0 %v2909_v1 }
  0x92   :  { %2311 = vmatmul.mubr.msk.bf16.gmra.mrb[64].mxu0 %vm305_vm0, %v2807_v25 }
  0x93   :  { %604 = vmatprep.mubr.bf16.mxu0 %v2909_v1 }
  0x9a   :  { %2312 = vmatmul.mubr.msk.bf16.gmra.mrb[68].mxu0 %vm305_vm0, %v2808_v26 }
  0x9b   :  { %614 = vmatprep.mubr.bf16.mxu0 %v2909_v1 }
  0xa2   :  { %2313 = vmatmul.mubr.msk.bf16.gmra.mrb[72].mxu0 %vm305_vm0, %v2809_v27 }
  0xa3   :  { %624 = vmatprep.mubr.bf16.mxu0 %v2909_v1 }
  0xaa   :  { %2314 = vmatmul.mubr.msk.bf16.gmra.mrb[76].mxu0 %vm305_vm0, %v2810_v28 }
  0xab   :  { %634 = vmatprep.mubr.bf16.mxu0 %v2909_v1 }
  0xb2   :  { %2315 = vmatmul.mubr.msk.bf16.gmra.mrb[80].mxu0 %vm305_vm0, %v2811_v29 }
  0xb3   :  { %644 = vmatprep.mubr.bf16.mxu0 %v2909_v1 }
  0xba   :  { %2316 = vmatmul.mubr.msk.bf16.gmra.mrb[84].mxu0 %vm305_vm0, %v2812_v30 }
  0xbb   :  { %654 = vmatprep.mubr.bf16.mxu0 %v2909_v1 }
  0xc2   :  { %2317 = vmatmul.mubr.msk.bf16.gmra.mrb[88].mxu0 %vm305_vm0, %v2813_v31 }
  0xc3   :  { %664 = vmatprep.mubr.bf16.mxu0 %v2909_v1 }
  0xca   :  { %2318 = vmatmul.mubr.msk.bf16.gmra.mrb[92].mxu0 %vm305_vm0, %v2814_v32 }
  0xcb   :  { %674 = vmatprep.mubr.bf16.mxu0 %v2909_v1 }
  0xd2   :  { %2319 = vmatmul.mubr.msk.bf16.gmra.mrb[96].mxu0 %vm305_vm0, %v2815_v33 }
  0xd3   :  { %684 = vmatprep.mubr.bf16.mxu0 %v2909_v1 }
  0xda   :  { %2320 = vmatmul.mubr.msk.bf16.gmra.mrb[100].mxu0 %vm305_vm0, %v2816_v34 }
  0xdb   :  { %694 = vmatprep.mubr.bf16.mxu0 %v2909_v1 }
  0xe2   :  { %2321 = vmatmul.mubr.msk.bf16.gmra.mrb[104].mxu0 %vm305_vm0, %v2817_v37  ;;  %v2821_v37 = vld [vmem:[%s3804_s0 + $0xf0] sm:$0xff]  }
  0xe3   :  { %704 = vmatprep.mubr.bf16.mxu0 %v2909_v1 }
  0xe5   :  { %v436_v43 = vpop.f32.mrb[0].mxu0 }
  0xe6   :  { %v437_v44 = vadd.f32 %v436_v43, %v3112_v41  ;;  %v438_v45 = vpop.f32.mrb[1].mxu0 }
  0xe7   :  { %v439_v47 = vadd.f32 %v438_v45, %v3116_v42  ;;  %v440_v48 = vpop.f32.mrb[2].mxu0 }
  0xe8   :  { %v441_v51 = vadd.f32 %v440_v48, %v3112_v41  ;;  %v442_v52 = vpop.f32.mrb[3].mxu0  ;;  %v755_v55 = vmax.f32 %v437_v44, 0.0 }
  0xe9   :  { %v443_v53 = vadd.f32 %v442_v52, %v3116_v42  ;;  %v756_v58 = vmax.f32 %v439_v47, 0.0 }
  0xea   :  { %v757_v56 = vmax.f32 %v441_v51, 0.0  ;;  %2322 = vmatmul.mubr.msk.bf16.gmra.mrb[108].mxu0 %vm305_vm0, %v2818_v46 }
  0xeb   :  { %v758_v59 = vmax.f32 %v443_v53, 0.0  ;;  %714 = vmatprep.mubr.bf16.mxu0 %v2909_v1 }
  0xec   :  { %v884_v62 = vpack.c.bf16 %v757_v56, %v755_v55  ;;  %v2822_v56 = vld [vmem:[%s3804_s0 + $0xf8] sm:$0xff]  }
  0xed   :  { %v446_v63 = vpop.f32.mrb[4].mxu0  ;;  %v885_v0 = vpack.c.bf16 %v758_v59, %v756_v58 }
  0xee   :  { %v447_v3 = vadd.f32 %v446_v63, %v3112_v41  ;;  %v448_v4 = vpop.f32.mrb[5].mxu0 }
  0xef   :  { %v449_v7 = vadd.f32 %v448_v4, %v3116_v42  ;;  %v450_v8 = vpop.f32.mrb[6].mxu0  ;;  %977 = vmatprep.subr.bf16.mxu1 %v885_v0 }
  0xf0   :  { %v451_v9 = vadd.f32 %v450_v8, %v3112_v41  ;;  %v452_v10 = vpop.f32.mrb[7].mxu0  ;;  %978 = vmatpush1.bf16.msra.mxu1 %v884_v62  ;;  %v759_v12 = vmax.f32 %v447_v3, 0.0 }
  0xf1   :  { %v453_v11 = vadd.f32 %v452_v10, %v3116_v42  ;;  %v760_v14 = vmax.f32 %v449_v7, 0.0 }
  0xf2   :  { %v761_v13 = vmax.f32 %v451_v9, 0.0  ;;  %2323 = vmatmul.mubr.msk.bf16.gmra.mrb[112].mxu0 %vm305_vm0, %v2819_v5 }
  0xf3   :  { %v762_v15 = vmax.f32 %v453_v11, 0.0  ;;  %724 = vmatprep.mubr.bf16.mxu0 %v2909_v1 }
  0xf4   :  { %v886_v16 = vpack.c.bf16 %v761_v13, %v759_v12 }
  0xf5   :  { %v887_v17 = vpack.c.bf16 %v762_v15, %v760_v14  ;;  %v456_v18 = vpop.f32.mrb[8].mxu0 }
  0xf6   :  { %v457_v19 = vadd.f32 %v456_v18, %v3112_v41  ;;  %v458_v20 = vpop.f32.mrb[9].mxu0 }
  0xf7   :  { %v459_v22 = vadd.f32 %v458_v20, %v3116_v42  ;;  %v460_v23 = vpop.f32.mrb[10].mxu0  ;;  %979 = vmatprep.subr.bf16.mxu1 %v887_v17 }
  0xf8   :  { %v461_v24 = vadd.f32 %v460_v23, %v3112_v41  ;;  %v462_v25 = vpop.f32.mrb[11].mxu0  ;;  %980 = vmatpush1.bf16.msra.mxu1 %v886_v16  ;;  %v763_v27 = vmax.f32 %v457_v19, 0.0 }
  0xf9   :  { %v463_v26 = vadd.f32 %v462_v25, %v3116_v42  ;;  %v764_v29 = vmax.f32 %v459_v22, 0.0 }
  0xfa   :  { %v765_v28 = vmax.f32 %v461_v24, 0.0  ;;  %2324 = vmatmul.mubr.msk.bf16.gmra.mrb[116].mxu0 %vm305_vm0, %v2820_v21 }
  0xfb   :  { %v766_v30 = vmax.f32 %v463_v26, 0.0  ;;  %734 = vmatprep.mubr.bf16.mxu0 %v2909_v1 }
  0xfc   :  { %v888_v31 = vpack.c.bf16 %v765_v28, %v763_v27 }
  0xfd   :  { %v889_v32 = vpack.c.bf16 %v766_v30, %v764_v29  ;;  %v466_v33 = vpop.f32.mrb[12].mxu0 }
  0xfe   :  { %v467_v34 = vadd.f32 %v466_v33, %v3112_v41  ;;  %v468_v35 = vpop.f32.mrb[13].mxu0 }
  0xff   :  { %v469_v39 = vadd.f32 %v468_v35, %v3116_v42  ;;  %v470_v43 = vpop.f32.mrb[14].mxu0  ;;  %981 = vmatprep.subr.bf16.mxu1 %v889_v32 }
 0x100   :  { %v471_v44 = vadd.f32 %v470_v43, %v3112_v41  ;;  %v472_v45 = vpop.f32.mrb[15].mxu0  ;;  %982 = vmatpush1.bf16.msra.mxu1 %v888_v31  ;;  %v767_v47 = vmax.f32 %v467_v34, 0.0 }
 0x101   :  { %v473_v46 = vadd.f32 %v472_v45, %v3116_v42  ;;  %v768_v49 = vmax.f32 %v469_v39, 0.0 }
 0x102   :  { %v769_v48 = vmax.f32 %v471_v44, 0.0  ;;  %2325 = vmatmul.mubr.msk.bf16.gmra.mrb[120].mxu0 %vm305_vm0, %v2821_v37 }
 0x103   :  { %v770_v50 = vmax.f32 %v473_v46, 0.0  ;;  %744 = vmatprep.mubr.bf16.mxu0 %v2909_v1 }
 0x104   :  { %v890_v51 = vpack.c.bf16 %v769_v48, %v767_v47 }
 0x105   :  { %v891_v52 = vpack.c.bf16 %v770_v50, %v768_v49  ;;  %v476_v53 = vpop.f32.mrb[16].mxu0 }
 0x106   :  { %v477_v54 = vadd.f32 %v476_v53, %v3112_v41  ;;  %v478_v55 = vpop.f32.mrb[17].mxu0 }
 0x107   :  { %v479_v57 = vadd.f32 %v478_v55, %v3116_v42  ;;  %v480_v58 = vpop.f32.mrb[18].mxu0  ;;  %983 = vmatprep.subr.bf16.mxu1 %v891_v52 }
 0x108   :  { %v481_v59 = vadd.f32 %v480_v58, %v3112_v41  ;;  %v482_v60 = vpop.f32.mrb[19].mxu0  ;;  %984 = vmatpush1.bf16.msra.mxu1 %v890_v51  ;;  %v771_v62 = vmax.f32 %v477_v54, 0.0 }
 0x109   :  { %v483_v61 = vadd.f32 %v482_v60, %v3116_v42  ;;  %v772_v0 = vmax.f32 %v479_v57, 0.0 }
 0x10a   :  { %v773_v63 = vmax.f32 %v481_v59, 0.0  ;;  %2326 = vmatmul.mubr.msk.bf16.gmra.mrb[124].mxu0 %vm305_vm0, %v2822_v56 }
 0x10b   :  { %v774_v3 = vmax.f32 %v483_v61, 0.0 }
 0x10c   :  { %v892_v4 = vpack.c.bf16 %v773_v63, %v771_v62 }
 0x10d   :  { %v893_v5 = vpack.c.bf16 %v774_v3, %v772_v0  ;;  %v486_v7 = vpop.f32.mrb[20].mxu0 }
 0x10e   :  { %v487_v8 = vadd.f32 %v486_v7, %v3112_v41  ;;  %v488_v9 = vpop.f32.mrb[21].mxu0 }
 0x10f   :  { %v489_v10 = vadd.f32 %v488_v9, %v3116_v42  ;;  %v490_v11 = vpop.f32.mrb[22].mxu0  ;;  %985 = vmatprep.subr.bf16.mxu1 %v893_v5 }
 0x110   :  { %v491_v12 = vadd.f32 %v490_v11, %v3112_v41  ;;  %v492_v13 = vpop.f32.mrb[23].mxu0  ;;  %986 = vmatpush1.bf16.msra.mxu1 %v892_v4  ;;  %v775_v15 = vmax.f32 %v487_v8, 0.0 }
 0x111   :  { %v493_v14 = vadd.f32 %v492_v13, %v3116_v42  ;;  %v776_v17 = vmax.f32 %v489_v10, 0.0 }
 0x112   :  { %v777_v16 = vmax.f32 %v491_v12, 0.0 }
 0x113   :  { %v778_v18 = vmax.f32 %v493_v14, 0.0 }
 0x114   :  { %v894_v19 = vpack.c.bf16 %v777_v16, %v775_v15 }
 0x115   :  { %v895_v20 = vpack.c.bf16 %v778_v18, %v776_v17  ;;  %v496_v21 = vpop.f32.mrb[24].mxu0 }
 0x116   :  { %v497_v22 = vadd.f32 %v496_v21, %v3112_v41  ;;  %v498_v23 = vpop.f32.mrb[25].mxu0 }
 0x117   :  { %v499_v24 = vadd.f32 %v498_v23, %v3116_v42  ;;  %v500_v25 = vpop.f32.mrb[26].mxu0  ;;  %987 = vmatprep.subr.bf16.mxu1 %v895_v20 }
 0x118   :  { %v501_v26 = vadd.f32 %v500_v25, %v3112_v41  ;;  %v502_v27 = vpop.f32.mrb[27].mxu0  ;;  %988 = vmatpush1.bf16.msra.mxu1 %v894_v19  ;;  %v779_v29 = vmax.f32 %v497_v22, 0.0 }
 0x119   :  { %v503_v28 = vadd.f32 %v502_v27, %v3116_v42  ;;  %v780_v31 = vmax.f32 %v499_v24, 0.0 }
 0x11a   :  { %v781_v30 = vmax.f32 %v501_v26, 0.0 }
 0x11b   :  { %v782_v32 = vmax.f32 %v503_v28, 0.0 }
 0x11c   :  { %v896_v33 = vpack.c.bf16 %v781_v30, %v779_v29 }
 0x11d   :  { %v897_v34 = vpack.c.bf16 %v782_v32, %v780_v31  ;;  %v506_v35 = vpop.f32.mrb[28].mxu0 }
 0x11e   :  { %v507_v37 = vadd.f32 %v506_v35, %v3112_v41  ;;  %v508_v39 = vpop.f32.mrb[29].mxu0 }
 0x11f   :  { %v509_v43 = vadd.f32 %v508_v39, %v3116_v42  ;;  %v510_v44 = vpop.f32.mrb[30].mxu0  ;;  %989 = vmatprep.subr.bf16.mxu1 %v897_v34 }
 0x120   :  { %v511_v45 = vadd.f32 %v510_v44, %v3112_v41  ;;  %v512_v46 = vpop.f32.mrb[31].mxu0  ;;  %990 = vmatpush1.bf16.msra.mxu1 %v896_v33  ;;  %v783_v48 = vmax.f32 %v507_v37, 0.0 }
 0x121   :  { %v513_v47 = vadd.f32 %v512_v46, %v3116_v42  ;;  %v784_v50 = vmax.f32 %v509_v43, 0.0 }
 0x122   :  { %v785_v49 = vmax.f32 %v511_v45, 0.0 }
 0x123   :  { %v786_v51 = vmax.f32 %v513_v47, 0.0 }
 0x124   :  { %v898_v52 = vpack.c.bf16 %v785_v49, %v783_v48 }
 0x125   :  { %v899_v53 = vpack.c.bf16 %v786_v51, %v784_v50  ;;  %v516_v54 = vpop.f32.mrb[32].mxu0 }
 0x126   :  { %v517_v55 = vadd.f32 %v516_v54, %v3112_v41  ;;  %v518_v56 = vpop.f32.mrb[33].mxu0 }
 0x127   :  { %v519_v57 = vadd.f32 %v518_v56, %v3116_v42  ;;  %v520_v58 = vpop.f32.mrb[34].mxu0  ;;  %991 = vmatprep.subr.bf16.mxu1 %v899_v53 }
 0x128   :  { %v521_v59 = vadd.f32 %v520_v58, %v3112_v41  ;;  %v522_v60 = vpop.f32.mrb[35].mxu0  ;;  %992 = vmatpush1.bf16.msra.mxu1 %v898_v52  ;;  %v787_v62 = vmax.f32 %v517_v55, 0.0 }
 0x129   :  { %v523_v61 = vadd.f32 %v522_v60, %v3116_v42  ;;  %v788_v0 = vmax.f32 %v519_v57, 0.0 }
 0x12a   :  { %v789_v63 = vmax.f32 %v521_v59, 0.0 }
 0x12b   :  { %v790_v3 = vmax.f32 %v523_v61, 0.0 }
 0x12c   :  { %v900_v4 = vpack.c.bf16 %v789_v63, %v787_v62 }
 0x12d   :  { %v901_v5 = vpack.c.bf16 %v790_v3, %v788_v0  ;;  %v526_v7 = vpop.f32.mrb[36].mxu0 }
 0x12e   :  { %v527_v8 = vadd.f32 %v526_v7, %v3112_v41  ;;  %v528_v9 = vpop.f32.mrb[37].mxu0 }
 0x12f   :  { %v529_v10 = vadd.f32 %v528_v9, %v3116_v42  ;;  %v530_v11 = vpop.f32.mrb[38].mxu0  ;;  %993 = vmatprep.subr.bf16.mxu1 %v901_v5 }
 0x130   :  { %v531_v12 = vadd.f32 %v530_v11, %v3112_v41  ;;  %v532_v13 = vpop.f32.mrb[39].mxu0  ;;  %994 = vmatpush1.bf16.msra.mxu1 %v900_v4  ;;  %v791_v15 = vmax.f32 %v527_v8, 0.0 }
 0x131   :  { %v533_v14 = vadd.f32 %v532_v13, %v3116_v42  ;;  %v792_v17 = vmax.f32 %v529_v10, 0.0 }
 0x132   :  { %v793_v16 = vmax.f32 %v531_v12, 0.0 }
 0x133   :  { %v794_v18 = vmax.f32 %v533_v14, 0.0 }
 0x134   :  { %v902_v19 = vpack.c.bf16 %v793_v16, %v791_v15 }
 0x135   :  { %v903_v20 = vpack.c.bf16 %v794_v18, %v792_v17  ;;  %v536_v21 = vpop.f32.mrb[40].mxu0 }
 0x136   :  { %v537_v22 = vadd.f32 %v536_v21, %v3112_v41  ;;  %v538_v23 = vpop.f32.mrb[41].mxu0 }
 0x137   :  { %v539_v24 = vadd.f32 %v538_v23, %v3116_v42  ;;  %v540_v25 = vpop.f32.mrb[42].mxu0  ;;  %995 = vmatprep.subr.bf16.mxu1 %v903_v20 }
 0x138   :  { %v541_v26 = vadd.f32 %v540_v25, %v3112_v41  ;;  %v542_v27 = vpop.f32.mrb[43].mxu0  ;;  %996 = vmatpush1.bf16.msra.mxu1 %v902_v19  ;;  %v795_v29 = vmax.f32 %v537_v22, 0.0 }
 0x139   :  { %v543_v28 = vadd.f32 %v542_v27, %v3116_v42  ;;  %v796_v31 = vmax.f32 %v539_v24, 0.0 }
 0x13a   :  { %v797_v30 = vmax.f32 %v541_v26, 0.0 }
 0x13b   :  { %v798_v32 = vmax.f32 %v543_v28, 0.0 }
 0x13c   :  { %v904_v33 = vpack.c.bf16 %v797_v30, %v795_v29 }
 0x13d   :  { %v905_v34 = vpack.c.bf16 %v798_v32, %v796_v31  ;;  %v546_v35 = vpop.f32.mrb[44].mxu0 }
 0x13e   :  { %v547_v37 = vadd.f32 %v546_v35, %v3112_v41  ;;  %v548_v39 = vpop.f32.mrb[45].mxu0 }
 0x13f   :  { %v549_v43 = vadd.f32 %v548_v39, %v3116_v42  ;;  %v550_v44 = vpop.f32.mrb[46].mxu0  ;;  %997 = vmatprep.subr.bf16.mxu1 %v905_v34 }
 0x140   :  { %v551_v45 = vadd.f32 %v550_v44, %v3112_v41  ;;  %v552_v46 = vpop.f32.mrb[47].mxu0  ;;  %998 = vmatpush1.bf16.msra.mxu1 %v904_v33  ;;  %v799_v48 = vmax.f32 %v547_v37, 0.0 }
 0x141   :  { %v553_v47 = vadd.f32 %v552_v46, %v3116_v42  ;;  %v800_v50 = vmax.f32 %v549_v43, 0.0 }
 0x142   :  { %v801_v49 = vmax.f32 %v551_v45, 0.0 }
 0x143   :  { %v802_v51 = vmax.f32 %v553_v47, 0.0 }
 0x144   :  { %v906_v52 = vpack.c.bf16 %v801_v49, %v799_v48 }
 0x145   :  { %v907_v53 = vpack.c.bf16 %v802_v51, %v800_v50  ;;  %v556_v54 = vpop.f32.mrb[48].mxu0 }
 0x146   :  { %v557_v55 = vadd.f32 %v556_v54, %v3112_v41  ;;  %v558_v56 = vpop.f32.mrb[49].mxu0 }
 0x147   :  { %v559_v57 = vadd.f32 %v558_v56, %v3116_v42  ;;  %v560_v58 = vpop.f32.mrb[50].mxu0  ;;  %999 = vmatprep.subr.bf16.mxu1 %v907_v53 }
 0x148   :  { %v561_v59 = vadd.f32 %v560_v58, %v3112_v41  ;;  %v562_v60 = vpop.f32.mrb[51].mxu0  ;;  %1000 = vmatpush1.bf16.msra.mxu1 %v906_v52  ;;  %v803_v62 = vmax.f32 %v557_v55, 0.0 }
 0x149   :  { %v563_v61 = vadd.f32 %v562_v60, %v3116_v42  ;;  %v804_v0 = vmax.f32 %v559_v57, 0.0 }
 0x14a   :  { %v805_v63 = vmax.f32 %v561_v59, 0.0 }
 0x14b   :  { %v806_v3 = vmax.f32 %v563_v61, 0.0  ;;  %v972_v61 = vcombine.high %v3132_v2, %v3132_v2 }
 0x14c   :  { %v908_v4 = vpack.c.bf16 %v805_v63, %v803_v62 }
 0x14d   :  { %v909_v5 = vpack.c.bf16 %v806_v3, %v804_v0  ;;  %v566_v7 = vpop.f32.mrb[52].mxu0 }
 0x14e   :  { %v567_v8 = vadd.f32 %v566_v7, %v3112_v41  ;;  %v568_v9 = vpop.f32.mrb[53].mxu0 }
 0x14f   :  { %v569_v10 = vadd.f32 %v568_v9, %v3116_v42  ;;  %v570_v11 = vpop.f32.mrb[54].mxu0  ;;  %1001 = vmatprep.subr.bf16.mxu1 %v909_v5 }
 0x150   :  { %v571_v12 = vadd.f32 %v570_v11, %v3112_v41  ;;  %v572_v13 = vpop.f32.mrb[55].mxu0  ;;  %1002 = vmatpush1.bf16.msra.mxu1 %v908_v4  ;;  %v807_v15 = vmax.f32 %v567_v8, 0.0 }
 0x151   :  { %v573_v14 = vadd.f32 %v572_v13, %v3116_v42  ;;  %v808_v17 = vmax.f32 %v569_v10, 0.0 }
 0x152   :  { %v809_v16 = vmax.f32 %v571_v12, 0.0 }
 0x153   :  { %v810_v18 = vmax.f32 %v573_v14, 0.0 }
 0x154   :  { %v910_v19 = vpack.c.bf16 %v809_v16, %v807_v15 }
 0x155   :  { %v911_v20 = vpack.c.bf16 %v810_v18, %v808_v17  ;;  %v576_v21 = vpop.f32.mrb[56].mxu0 }
 0x156   :  { %v577_v22 = vadd.f32 %v576_v21, %v3112_v41  ;;  %v578_v23 = vpop.f32.mrb[57].mxu0 }
 0x157   :  { %v579_v24 = vadd.f32 %v578_v23, %v3116_v42  ;;  %v580_v25 = vpop.f32.mrb[58].mxu0  ;;  %1003 = vmatprep.subr.bf16.mxu1 %v911_v20 }
 0x158   :  { %v581_v26 = vadd.f32 %v580_v25, %v3112_v41  ;;  %v582_v27 = vpop.f32.mrb[59].mxu0  ;;  %1004 = vmatpush1.bf16.msra.mxu1 %v910_v19  ;;  %v811_v29 = vmax.f32 %v577_v22, 0.0 }
 0x159   :  { %v583_v28 = vadd.f32 %v582_v27, %v3116_v42  ;;  %v812_v31 = vmax.f32 %v579_v24, 0.0 }
 0x15a   :  { %v813_v30 = vmax.f32 %v581_v26, 0.0 }
 0x15b   :  { %v814_v32 = vmax.f32 %v583_v28, 0.0 }
 0x15c   :  { %v912_v33 = vpack.c.bf16 %v813_v30, %v811_v29 }
 0x15d   :  { %v913_v34 = vpack.c.bf16 %v814_v32, %v812_v31  ;;  %v586_v35 = vpop.f32.mrb[60].mxu0 }
 0x15e   :  { %v587_v37 = vadd.f32 %v586_v35, %v3112_v41  ;;  %v588_v39 = vpop.f32.mrb[61].mxu0 }
 0x15f   :  { %v589_v43 = vadd.f32 %v588_v39, %v3116_v42  ;;  %v590_v44 = vpop.f32.mrb[62].mxu0  ;;  %1005 = vmatprep.subr.bf16.mxu1 %v913_v34 }
 0x160   :  { %v591_v45 = vadd.f32 %v590_v44, %v3112_v41  ;;  %v592_v46 = vpop.f32.mrb[63].mxu0  ;;  %1006 = vmatpush1.bf16.msra.mxu1 %v912_v33  ;;  %v815_v48 = vmax.f32 %v587_v37, 0.0 }
 0x161   :  { %v593_v47 = vadd.f32 %v592_v46, %v3116_v42  ;;  %v816_v50 = vmax.f32 %v589_v43, 0.0 }
 0x162   :  { %v817_v49 = vmax.f32 %v591_v45, 0.0 }
 0x163   :  { %v818_v51 = vmax.f32 %v593_v47, 0.0 }
 0x164   :  { %v914_v52 = vpack.c.bf16 %v817_v49, %v815_v48 }
 0x165   :  { %v915_v53 = vpack.c.bf16 %v818_v51, %v816_v50  ;;  %v596_v54 = vpop.f32.mrb[64].mxu0 }
 0x166   :  { %v597_v55 = vadd.f32 %v596_v54, %v3112_v41  ;;  %v598_v56 = vpop.f32.mrb[65].mxu0 }
 0x167   :  { %v599_v57 = vadd.f32 %v598_v56, %v3116_v42  ;;  %v600_v58 = vpop.f32.mrb[66].mxu0  ;;  %1007 = vmatprep.subr.bf16.mxu1 %v915_v53 }
 0x168   :  { %v601_v59 = vadd.f32 %v600_v58, %v3112_v41  ;;  %v602_v60 = vpop.f32.mrb[67].mxu0  ;;  %1008 = vmatpush1.bf16.msra.mxu1 %v914_v52  ;;  %v819_v63 = vmax.f32 %v597_v55, 0.0 }
 0x169   :  { %v603_v62 = vadd.f32 %v602_v60, %v3116_v42  ;;  %v820_v3 = vmax.f32 %v599_v57, 0.0 }
 0x16a   :  { %v821_v0 = vmax.f32 %v601_v59, 0.0 }
 0x16b   :  { %v822_v4 = vmax.f32 %v603_v62, 0.0  ;;  %1010 = vmatmul.mubr.bf16.vlgmr.msra.gmra.mrb[0].mxu1 %v3138_v6 }
 0x16c   :  { %v916_v5 = vpack.c.bf16 %v821_v0, %v819_v63  ;;  %1050 = vmatprep.mubr.bf16.mxu1 %v972_v61 }
 0x16d   :  { %v917_v7 = vpack.c.bf16 %v822_v4, %v820_v3  ;;  %v606_v8 = vpop.f32.mrb[68].mxu0 }
 0x16e   :  { %v607_v9 = vadd.f32 %v606_v8, %v3112_v41  ;;  %v608_v10 = vpop.f32.mrb[69].mxu0 }
 0x16f   :  { %v609_v11 = vadd.f32 %v608_v10, %v3116_v42  ;;  %v610_v12 = vpop.f32.mrb[70].mxu0  ;;  %1018 = vmatprep.subr.bf16.mxu1 %v917_v7 }
 0x170   :  { %v611_v2 = vadd.f32 %v610_v12, %v3112_v41  ;;  %v612_v13 = vpop.f32.mrb[71].mxu0  ;;  %1019 = vmatpush1.bf16.msra.mxu1 %v916_v5  ;;  %v823_v15 = vmax.f32 %v607_v9, 0.0 }
 0x171   :  { %v613_v14 = vadd.f32 %v612_v13, %v3116_v42  ;;  %v824_v17 = vmax.f32 %v609_v11, 0.0 }
 0x172   :  { %v825_v16 = vmax.f32 %v611_v2, 0.0 }
 0x173   :  { %v826_v18 = vmax.f32 %v613_v14, 0.0 }
 0x174   :  { %v918_v19 = vpack.c.bf16 %v825_v16, %v823_v15 }
 0x175   :  { %v919_v20 = vpack.c.bf16 %v826_v18, %v824_v17  ;;  %v616_v21 = vpop.f32.mrb[72].mxu0 }
 0x176   :  { %v617_v22 = vadd.f32 %v616_v21, %v3112_v41  ;;  %v618_v23 = vpop.f32.mrb[73].mxu0 }
 0x177   :  { %v619_v24 = vadd.f32 %v618_v23, %v3116_v42  ;;  %v620_v25 = vpop.f32.mrb[74].mxu0  ;;  %1020 = vmatprep.subr.bf16.mxu1 %v919_v20 }
 0x178   :  { %v621_v26 = vadd.f32 %v620_v25, %v3112_v41  ;;  %v622_v27 = vpop.f32.mrb[75].mxu0  ;;  %1021 = vmatpush1.bf16.msra.mxu1 %v918_v19  ;;  %v827_v29 = vmax.f32 %v617_v22, 0.0 }
 0x179   :  { %v623_v28 = vadd.f32 %v622_v27, %v3116_v42  ;;  %v828_v31 = vmax.f32 %v619_v24, 0.0 }
 0x17a   :  { %v829_v30 = vmax.f32 %v621_v26, 0.0 }
 0x17b   :  { %v830_v32 = vmax.f32 %v623_v28, 0.0 }
 0x17c   :  { %v920_v33 = vpack.c.bf16 %v829_v30, %v827_v29 }
 0x17d   :  { %v921_v34 = vpack.c.bf16 %v830_v32, %v828_v31  ;;  %v626_v35 = vpop.f32.mrb[76].mxu0 }
 0x17e   :  { %v627_v37 = vadd.f32 %v626_v35, %v3112_v41  ;;  %v628_v39 = vpop.f32.mrb[77].mxu0 }
 0x17f   :  { %v629_v43 = vadd.f32 %v628_v39, %v3116_v42  ;;  %v630_v44 = vpop.f32.mrb[78].mxu0  ;;  %1022 = vmatprep.subr.bf16.mxu1 %v921_v34 }
 0x180   :  { %v631_v45 = vadd.f32 %v630_v44, %v3112_v41  ;;  %v632_v46 = vpop.f32.mrb[79].mxu0  ;;  %1023 = vmatpush1.bf16.msra.mxu1 %v920_v33  ;;  %v831_v48 = vmax.f32 %v627_v37, 0.0 }
 0x181   :  { %v633_v47 = vadd.f32 %v632_v46, %v3116_v42  ;;  %v832_v50 = vmax.f32 %v629_v43, 0.0 }
 0x182   :  { %v833_v49 = vmax.f32 %v631_v45, 0.0 }
 0x183   :  { %v834_v51 = vmax.f32 %v633_v47, 0.0 }
 0x184   :  { %v922_v52 = vpack.c.bf16 %v833_v49, %v831_v48 }
 0x185   :  { %v923_v53 = vpack.c.bf16 %v834_v51, %v832_v50  ;;  %v636_v54 = vpop.f32.mrb[80].mxu0 }
 0x186   :  { %v637_v55 = vadd.f32 %v636_v54, %v3112_v41  ;;  %v638_v56 = vpop.f32.mrb[81].mxu0 }
 0x187   :  { %v639_v57 = vadd.f32 %v638_v56, %v3116_v42  ;;  %v640_v58 = vpop.f32.mrb[82].mxu0  ;;  %1024 = vmatprep.subr.bf16.mxu1 %v923_v53 }
 0x188   :  { %v641_v59 = vadd.f32 %v640_v58, %v3112_v41  ;;  %v642_v60 = vpop.f32.mrb[83].mxu0  ;;  %1025 = vmatpush1.bf16.msra.mxu1 %v922_v52  ;;  %v835_v62 = vmax.f32 %v637_v55, 0.0 }
 0x189   :  { %v643_v61 = vadd.f32 %v642_v60, %v3116_v42  ;;  %v836_v0 = vmax.f32 %v639_v57, 0.0 }
 0x18a   :  { %v837_v63 = vmax.f32 %v641_v59, 0.0 }
 0x18b   :  { %v838_v3 = vmax.f32 %v643_v61, 0.0 }
 0x18c   :  { %v924_v4 = vpack.c.bf16 %v837_v63, %v835_v62 }
 0x18d   :  { %v925_v5 = vpack.c.bf16 %v838_v3, %v836_v0  ;;  %v646_v7 = vpop.f32.mrb[84].mxu0 }
 0x18e   :  { %v647_v8 = vadd.f32 %v646_v7, %v3112_v41  ;;  %v648_v9 = vpop.f32.mrb[85].mxu0 }
 0x18f   :  { %v649_v10 = vadd.f32 %v648_v9, %v3116_v42  ;;  %v650_v11 = vpop.f32.mrb[86].mxu0  ;;  %1026 = vmatprep.subr.bf16.mxu1 %v925_v5 }
 0x190   :  { %v651_v12 = vadd.f32 %v650_v11, %v3112_v41  ;;  %v652_v2 = vpop.f32.mrb[87].mxu0  ;;  %1027 = vmatpush1.bf16.msra.mxu1 %v924_v4  ;;  %v839_v14 = vmax.f32 %v647_v8, 0.0 }
 0x191   :  { %v653_v13 = vadd.f32 %v652_v2, %v3116_v42  ;;  %v840_v16 = vmax.f32 %v649_v10, 0.0 }
 0x192   :  { %v841_v15 = vmax.f32 %v651_v12, 0.0 }
 0x193   :  { %v842_v17 = vmax.f32 %v653_v13, 0.0 }
 0x194   :  { %v926_v18 = vpack.c.bf16 %v841_v15, %v839_v14 }
 0x195   :  { %v927_v19 = vpack.c.bf16 %v842_v17, %v840_v16  ;;  %v656_v20 = vpop.f32.mrb[88].mxu0 }
 0x196   :  { %v657_v21 = vadd.f32 %v656_v20, %v3112_v41  ;;  %v658_v22 = vpop.f32.mrb[89].mxu0 }
 0x197   :  { %v659_v23 = vadd.f32 %v658_v22, %v3116_v42  ;;  %v660_v24 = vpop.f32.mrb[90].mxu0  ;;  %1028 = vmatprep.subr.bf16.mxu1 %v927_v19 }
 0x198   :  { %v661_v25 = vadd.f32 %v660_v24, %v3112_v41  ;;  %v662_v26 = vpop.f32.mrb[91].mxu0  ;;  %1029 = vmatpush1.bf16.msra.mxu1 %v926_v18  ;;  %v843_v28 = vmax.f32 %v657_v21, 0.0 }
 0x199   :  { %v663_v27 = vadd.f32 %v662_v26, %v3116_v42  ;;  %v844_v30 = vmax.f32 %v659_v23, 0.0 }
 0x19a   :  { %v845_v29 = vmax.f32 %v661_v25, 0.0 }
 0x19b   :  { %v846_v31 = vmax.f32 %v663_v27, 0.0 }
 0x19c   :  { %v928_v32 = vpack.c.bf16 %v845_v29, %v843_v28 }
 0x19d   :  { %v929_v33 = vpack.c.bf16 %v846_v31, %v844_v30  ;;  %v666_v34 = vpop.f32.mrb[92].mxu0 }
 0x19e   :  { %v667_v35 = vadd.f32 %v666_v34, %v3112_v41  ;;  %v668_v37 = vpop.f32.mrb[93].mxu0 }
 0x19f   :  { %v669_v39 = vadd.f32 %v668_v37, %v3116_v42  ;;  %v670_v43 = vpop.f32.mrb[94].mxu0  ;;  %1030 = vmatprep.subr.bf16.mxu1 %v929_v33 }
 0x1a0   :  { %v671_v44 = vadd.f32 %v670_v43, %v3112_v41  ;;  %v672_v45 = vpop.f32.mrb[95].mxu0  ;;  %1031 = vmatpush1.bf16.msra.mxu1 %v928_v32  ;;  %v847_v47 = vmax.f32 %v667_v35, 0.0 }
 0x1a1   :  { %v673_v46 = vadd.f32 %v672_v45, %v3116_v42  ;;  %v848_v49 = vmax.f32 %v669_v39, 0.0 }
 0x1a2   :  { %v849_v48 = vmax.f32 %v671_v44, 0.0 }
 0x1a3   :  { %v850_v50 = vmax.f32 %v673_v46, 0.0 }
 0x1a4   :  { %v930_v51 = vpack.c.bf16 %v849_v48, %v847_v47 }
 0x1a5   :  { %v931_v52 = vpack.c.bf16 %v850_v50, %v848_v49  ;;  %v676_v53 = vpop.f32.mrb[96].mxu0 }
 0x1a6   :  { %v677_v54 = vadd.f32 %v676_v53, %v3112_v41  ;;  %v678_v55 = vpop.f32.mrb[97].mxu0 }
 0x1a7   :  { %v679_v56 = vadd.f32 %v678_v55, %v3116_v42  ;;  %v680_v57 = vpop.f32.mrb[98].mxu0  ;;  %1032 = vmatprep.subr.bf16.mxu1 %v931_v52 }
 0x1a8   :  { %v681_v58 = vadd.f32 %v680_v57, %v3112_v41  ;;  %v682_v59 = vpop.f32.mrb[99].mxu0  ;;  %1033 = vmatpush1.bf16.msra.mxu1 %v930_v51  ;;  %v851_v61 = vmax.f32 %v677_v54, 0.0 }
 0x1a9   :  { %v683_v60 = vadd.f32 %v682_v59, %v3116_v42  ;;  %v852_v63 = vmax.f32 %v679_v56, 0.0 }
 0x1aa   :  { %v853_v62 = vmax.f32 %v681_v58, 0.0 }
 0x1ab   :  { %v854_v0 = vmax.f32 %v683_v60, 0.0 }
 0x1ac   :  { %v932_v3 = vpack.c.bf16 %v853_v62, %v851_v61 }
 0x1ad   :  { %v933_v4 = vpack.c.bf16 %v854_v0, %v852_v63  ;;  %v686_v5 = vpop.f32.mrb[100].mxu0 }
 0x1ae   :  { %v687_v7 = vadd.f32 %v686_v5, %v3112_v41  ;;  %v688_v8 = vpop.f32.mrb[101].mxu0 }
 0x1af   :  { %v689_v9 = vadd.f32 %v688_v8, %v3116_v42  ;;  %v690_v10 = vpop.f32.mrb[102].mxu0  ;;  %1034 = vmatprep.subr.bf16.mxu1 %v933_v4 }
 0x1b0   :  { %v691_v11 = vadd.f32 %v690_v10, %v3112_v41  ;;  %v692_v12 = vpop.f32.mrb[103].mxu0  ;;  %1035 = vmatpush1.bf16.msra.mxu1 %v932_v3  ;;  %v855_v13 = vmax.f32 %v687_v7, 0.0 }
 0x1b1   :  { %v693_v2 = vadd.f32 %v692_v12, %v3116_v42  ;;  %v856_v15 = vmax.f32 %v689_v9, 0.0 }
 0x1b2   :  { %v857_v14 = vmax.f32 %v691_v11, 0.0 }
 0x1b3   :  { %v858_v16 = vmax.f32 %v693_v2, 0.0 }
 0x1b4   :  { %v934_v17 = vpack.c.bf16 %v857_v14, %v855_v13 }
 0x1b5   :  { %v935_v18 = vpack.c.bf16 %v858_v16, %v856_v15  ;;  %v696_v19 = vpop.f32.mrb[104].mxu0 }
 0x1b6   :  { %v697_v20 = vadd.f32 %v696_v19, %v3112_v41  ;;  %v698_v21 = vpop.f32.mrb[105].mxu0 }
 0x1b7   :  { %v699_v22 = vadd.f32 %v698_v21, %v3116_v42  ;;  %v700_v23 = vpop.f32.mrb[106].mxu0  ;;  %1036 = vmatprep.subr.bf16.mxu1 %v935_v18 }
 0x1b8   :  { %v701_v24 = vadd.f32 %v700_v23, %v3112_v41  ;;  %v702_v25 = vpop.f32.mrb[107].mxu0  ;;  %1037 = vmatpush1.bf16.msra.mxu1 %v934_v17  ;;  %v859_v27 = vmax.f32 %v697_v20, 0.0 }
 0x1b9   :  { %v703_v26 = vadd.f32 %v702_v25, %v3116_v42  ;;  %v860_v29 = vmax.f32 %v699_v22, 0.0 }
 0x1ba   :  { %v861_v28 = vmax.f32 %v701_v24, 0.0 }
 0x1bb   :  { %v862_v30 = vmax.f32 %v703_v26, 0.0 }
 0x1bc   :  { %v936_v31 = vpack.c.bf16 %v861_v28, %v859_v27 }
 0x1bd   :  { %v937_v32 = vpack.c.bf16 %v862_v30, %v860_v29  ;;  %v706_v33 = vpop.f32.mrb[108].mxu0 }
 0x1be   :  { %v707_v34 = vadd.f32 %v706_v33, %v3112_v41  ;;  %v708_v35 = vpop.f32.mrb[109].mxu0 }
 0x1bf   :  { %v709_v37 = vadd.f32 %v708_v35, %v3116_v42  ;;  %v710_v39 = vpop.f32.mrb[110].mxu0  ;;  %1038 = vmatprep.subr.bf16.mxu1 %v937_v32 }
 0x1c0   :  { %v711_v43 = vadd.f32 %v710_v39, %v3112_v41  ;;  %v712_v44 = vpop.f32.mrb[111].mxu0  ;;  %1039 = vmatpush1.bf16.msra.mxu1 %v936_v31  ;;  %v863_v46 = vmax.f32 %v707_v34, 0.0 }
 0x1c1   :  { %v713_v45 = vadd.f32 %v712_v44, %v3116_v42  ;;  %v864_v48 = vmax.f32 %v709_v37, 0.0 }
 0x1c2   :  { %v865_v47 = vmax.f32 %v711_v43, 0.0 }
 0x1c3   :  { %v866_v49 = vmax.f32 %v713_v45, 0.0 }
 0x1c4   :  { %v938_v50 = vpack.c.bf16 %v865_v47, %v863_v46 }
 0x1c5   :  { %v939_v51 = vpack.c.bf16 %v866_v49, %v864_v48  ;;  %v716_v52 = vpop.f32.mrb[112].mxu0 }
 0x1c6   :  { %v717_v53 = vadd.f32 %v716_v52, %v3112_v41  ;;  %v718_v54 = vpop.f32.mrb[113].mxu0  ;;  %v971_v52 = vcombine.high %v3138_v6, %v3138_v6  ;;  %v3305_v6 = vld [vmem:[%s3803_s2 + $0x78] ss:$12 sps:$4 sm:$0xff]  }
 0x1c7   :  { %v719_v55 = vadd.f32 %v718_v54, %v3116_v42  ;;  %v720_v56 = vpop.f32.mrb[114].mxu0  ;;  %1040 = vmatprep.subr.bf16.mxu1 %v939_v51  ;;  %v3286_v51 = vld [vmem:[%s3803_s2 + $0x64] ss:$12 sps:$4 sm:$0xff]  }
 0x1c8   :  { %v721_v57 = vadd.f32 %v720_v56, %v3112_v41  ;;  %v722_v58 = vpop.f32.mrb[115].mxu0  ;;  %1041 = vmatpush1.bf16.msra.mxu1 %v938_v50  ;;  %v867_v60 = vmax.f32 %v717_v53, 0.0  ;;  %v3312_v53 = vld [vmem:[%s3803_s2 + $0x94] ss:$12 sps:$4 sm:$0xff]   ;;  %v3318_v54 = vld [vmem:[%s3803_s2 + $0x90] ss:$12 sps:$4 sm:$0xff]  }
 0x1c9   :  { %v723_v59 = vadd.f32 %v722_v58, %v3116_v42  ;;  %v868_v62 = vmax.f32 %v719_v55, 0.0  ;;  %v3324_v55 = vld [vmem:[%s3803_s2 + $0xac] ss:$12 sps:$4 sm:$0xff]   ;;  %v3330_v56 = vld [vmem:[%s3803_s2 + $0xa8] ss:$12 sps:$4 sm:$0xff]  }
 0x1ca   :  { %v869_v61 = vmax.f32 %v721_v57, 0.0  ;;  %v3336_v57 = vld [vmem:[%s3803_s2 + $0xc4] ss:$12 sps:$4 sm:$0xff]   ;;  %v3342_v58 = vld [vmem:[%s3803_s2 + $0xc0] ss:$12 sps:$4 sm:$0xff]  }
 0x1cb   :  { %v870_v63 = vmax.f32 %v723_v59, 0.0  ;;  %v3348_v59 = vld [vmem:[%s3803_s2 + $0xdc] ss:$12 sps:$4 sm:$0xff]  }
 0x1cc   :  { %v940_v0 = vpack.c.bf16 %v869_v61, %v867_v60  ;;  %v3354_v60 = vld [vmem:[%s3803_s2 + $0xd8] ss:$12 sps:$4 sm:$0xff]   ;;  %v3360_v61 = vld [vmem:[%s3803_s2 + $0xf4] ss:$12 sps:$4 sm:$0xff]  }
 0x1cd   :  { %v941_v3 = vpack.c.bf16 %v870_v63, %v868_v62  ;;  %v726_v4 = vpop.f32.mrb[116].mxu0  ;;  %v3366_v62 = vld [vmem:[%s3803_s2 + $0xf0] ss:$12 sps:$4 sm:$0xff]   ;;  %v3372_v63 = vld [vmem:[%s3803_s2 + $0x10c] ss:$12 sps:$4 sm:$0xff]  }
 0x1ce   :  { %v727_v5 = vadd.f32 %v726_v4, %v3112_v41  ;;  %v728_v7 = vpop.f32.mrb[117].mxu0  ;;  %v3387_v4 = vld [vmem:[%s3807_s3 + $0x40] sm:$0xff]  }
 0x1cf   :  { %v729_v8 = vadd.f32 %v728_v7, %v3116_v42  ;;  %v730_v9 = vpop.f32.mrb[118].mxu0  ;;  %1042 = vmatprep.subr.bf16.mxu1 %v941_v3  ;;  %v2911_v3 = vmov 0.0   ;;  %v3403_v7 = vld [vmem:[%s3807_s3 + $0x50] sm:$0xff]  }
 0x1d0   :  { %v731_v10 = vadd.f32 %v730_v9, %v3112_v41  ;;  %v732_v11 = vpop.f32.mrb[119].mxu0  ;;  %1043 = vmatpush1.bf16.msra.mxu1 %v940_v0  ;;  %v871_v2 = vmax.f32 %v727_v5, 0.0  ;;  %v3378_v0 = vld [vmem:[%s3803_s2 + $0x108] ss:$12 sps:$4 sm:$0xff]   ;;  %2542 = vmatprep.subr.bf16.mxu0 %v2911_v3  ;;  %v3416_v9 = vld [vmem:[%s3807_s3 + $0x60] sm:$0xff]  }
 0x1d1   :  { %v733_v12 = vadd.f32 %v732_v11, %v3116_v42  ;;  %v872_v14 = vmax.f32 %v729_v8, 0.0  ;;  %2558 = vmatprep.mubr.msk.bf16.mxu0 %vm2912_vm1, %v2911_v3  ;;  %2543 = vmatpush3.bf16.msra.mxu0 %v3387_v4  ;;  %v3396_v5 = vld [vmem:[%s3807_s3 + $0x48] sm:$0xff]   ;;  %v3410_v8 = vld [vmem:[%s3807_s3 + $0x58] sm:$0xff]  }
 0x1d2   :  { %v873_v13 = vmax.f32 %v731_v10, 0.0  ;;  %2544 = vmatprep.subr.bf16.mxu0 %v2911_v3  ;;  %v3423_v10 = vld [vmem:[%s3807_s3 + $0x68] sm:$0xff]  }
 0x1d3   :  { %v874_v15 = vmax.f32 %v733_v12, 0.0  ;;  %v2847_v12 = vld [vmem:[%s3803_s2 + $0x68] ss:$12 sps:$4 sm:$0xff]  }
 0x1d4   :  { %v942_v16 = vpack.c.bf16 %v873_v13, %v871_v2 }
 0x1d5   :  { %v943_v17 = vpack.c.bf16 %v874_v15, %v872_v14  ;;  %v736_v18 = vpop.f32.mrb[120].mxu0  ;;  %2545 = vmatpush3.bf16.msra.mxu0 %v3396_v5 }
 0x1d6   :  { %v737_v19 = vadd.f32 %v736_v18, %v3112_v41  ;;  %v738_v20 = vpop.f32.mrb[121].mxu0  ;;  %2546 = vmatprep.subr.bf16.mxu0 %v2911_v3  ;;  %v2850_v18 = vld [vmem:[%s3803_s2 + $0xb0] ss:$12 sps:$4 sm:$0xff]  }
 0x1d7   :  { %v739_v21 = vadd.f32 %v738_v20, %v3116_v42  ;;  %v740_v22 = vpop.f32.mrb[122].mxu0  ;;  %1044 = vmatprep.subr.bf16.mxu1 %v943_v17  ;;  %v2849_v17 = vld [vmem:[%s3803_s2 + $0x98] ss:$12 sps:$4 sm:$0xff]   ;;  %v2852_v20 = vld [vmem:[%s3803_s2 + $0xe0] ss:$12 sps:$4 sm:$0xff]  }
 0x1d8   :  { %v741_v23 = vadd.f32 %v740_v22, %v3112_v41  ;;  %v742_v24 = vpop.f32.mrb[123].mxu0  ;;  %1045 = vmatpush1.bf16.msra.mxu1 %v942_v16  ;;  %v875_v26 = vmax.f32 %v737_v19, 0.0  ;;  %v2848_v16 = vld [vmem:[%s3803_s2 + $0x80] ss:$12 sps:$4 sm:$0xff]   ;;  %v2851_v19 = vld [vmem:[%s3803_s2 + $0xc8] ss:$12 sps:$4 sm:$0xff]  }
 0x1d9   :  { %v743_v25 = vadd.f32 %v742_v24, %v3116_v42  ;;  %v876_v28 = vmax.f32 %v739_v21, 0.0  ;;  %2547 = vmatpush3.bf16.msra.mxu0 %v3403_v7  ;;  %v2853_v21 = vld [vmem:[%s3803_s2 + $0xf8] ss:$12 sps:$4 sm:$0xff]   ;;  %v2854_v22 = vld [vmem:[%s3803_s2 + $0x110] ss:$12 sps:$4 sm:$0xff]  }
 0x1da   :  { %v877_v27 = vmax.f32 %v741_v23, 0.0  ;;  %2548 = vmatprep.subr.bf16.mxu0 %v2911_v3  ;;  %v3498_v23 = vld [vmem:[%s3807_s3 + $0x70] sm:$0xff]   ;;  %v3520_v24 = vld [vmem:[%s3807_s3 + $0x78] sm:$0xff]  }
 0x1db   :  { %v878_v29 = vmax.f32 %v743_v25, 0.0 }
 0x1dc   :  { %v944_v30 = vpack.c.bf16 %v877_v27, %v875_v26 }
 0x1dd   :  { %v945_v31 = vpack.c.bf16 %v878_v29, %v876_v28  ;;  %v746_v32 = vpop.f32.mrb[124].mxu0  ;;  %2549 = vmatpush3.bf16.msra.mxu0 %v3410_v8 }
 0x1de   :  { %v747_v33 = vadd.f32 %v746_v32, %v3112_v41  ;;  %v748_v34 = vpop.f32.mrb[125].mxu0  ;;  %2550 = vmatprep.subr.bf16.mxu0 %v2911_v3 }
 0x1df   :  { %v749_v35 = vadd.f32 %v748_v34, %v3116_v42  ;;  %v750_v37 = vpop.f32.mrb[126].mxu0  ;;  %1046 = vmatprep.subr.bf16.mxu1 %v945_v31 }
 0x1e0   :  { %v751_v39 = vadd.f32 %v750_v37, %v3112_v41  ;;  %v752_v43 = vpop.f32.mrb[127].mxu0  ;;  %1047 = vmatpush1.bf16.msra.mxu1 %v944_v30  ;;  %v879_v45 = vmax.f32 %v747_v33, 0.0  ;;  %v3293_v41 = vld [vmem:[%s3803_s2 + $0x60] ss:$12 sps:$4 sm:$0xff]  }
 0x1e1   :  { %v753_v44 = vadd.f32 %v752_v43, %v3116_v42  ;;  %v880_v47 = vmax.f32 %v749_v35, 0.0  ;;  %v3299_v42 = vld [vmem:[%s3803_s2 + $0x7c] ss:$12 sps:$4 sm:$0xff]   ;;  %2551 = vmatpush3.bf16.msra.mxu0 %v3416_v9 }
 0x1e2   :  { %v881_v46 = vmax.f32 %v751_v39, 0.0  ;;  %2552 = vmatprep.subr.bf16.mxu0 %v2911_v3  ;;  %v2328_v33 = vld [vmem:[%s3805_s4 + $0x1] ss:$8 sm:$0x7] }
 0x1e3   :  { %v882_v48 = vmax.f32 %v753_v44, 0.0  ;;  %v1102_v34 = vrot.slane %v2328_v33, %v101_v40  ;;  %v1098_v35 = vrot.slane %v2328_v33, %v97_v38  ;;  %v1105_v38 = vsub.s32 2, %v3098_v36  ;;  %v2864_v36 = vld [vmem:[%s3807_s3 + $0xc8] sm:$0xff]  }
 0x1e4   :  { %v946_v49 = vpack.c.bf16 %v881_v46, %v879_v45 }
 0x1e5   :  { %v947_v50 = vpack.c.bf16 %v882_v48, %v880_v47  ;;  %2553 = vmatpush3.bf16.msra.mxu0 %v3423_v10  ;;  %v1106_v40 = vrot.slane %v2328_v33, %v1105_v38 }
 0x1e6   :  { %2554 = vmatprep.subr.bf16.mxu0 %v2911_v3 }
 0x1e7   :  { %1048 = vmatprep.subr.bf16.mxu1 %v947_v50 }
 0x1e8   :  { %1049 = vmatpush1.bf16.msra.mxu1 %v946_v49 }
 0x1e9   :  { %1238 = vmatprep.subr.bf16.mxu1 %v3286_v51  ;;  %2555 = vmatpush3.bf16.msra.mxu0 %v3498_v23 }
 0x1ea   :  { %2556 = vmatprep.subr.bf16.mxu0 %v2911_v3 }
 0x1eb   :  { %1051 = vmatmul.mubr.bf16.vlgmr.msra.gmra.mrb[0].mxu1 %v971_v52 }
 0x1ec   :  { %1239 = vmatpush1.bf16.msra.mxu1 %v3293_v41  ;;  %1270 = vmatprep.mubr.bf16.mxu1 %v2909_v1 }
 0x1ed   :  { %1240 = vmatprep.subr.bf16.mxu1 %v3299_v42  ;;  %2557 = vmatpush3.bf16.msra.mxu0 %v3520_v24 }
 0x1ee   :  { %2582 = vmatprep.subr.bf16.mxu0 %v2911_v3 }
 0x1f0   :  { %1241 = vmatpush1.bf16.msra.mxu1 %v3305_v6 }
 0x1f1   :  { %1242 = vmatprep.subr.bf16.mxu1 %v3312_v53 }
 0x1f4   :  { %1243 = vmatpush1.bf16.msra.mxu1 %v3318_v54 }
 0x1f5   :  { %1244 = vmatprep.subr.bf16.mxu1 %v3324_v55 }
 0x1f8   :  { %1245 = vmatpush1.bf16.msra.mxu1 %v3330_v56 }
 0x1f9   :  { %1246 = vmatprep.subr.bf16.mxu1 %v3336_v57 }
 0x1fc   :  { %1247 = vmatpush1.bf16.msra.mxu1 %v3342_v58 }
 0x1fd   :  { %1248 = vmatprep.subr.bf16.mxu1 %v3348_v59 }
 0x200   :  { %1249 = vmatpush1.bf16.msra.mxu1 %v3354_v60 }
 0x201   :  { %1250 = vmatprep.subr.bf16.mxu1 %v3360_v61 }
 0x204   :  { %1251 = vmatpush1.bf16.msra.mxu1 %v3366_v62 }
 0x205   :  { %1252 = vmatprep.subr.bf16.mxu1 %v3372_v63 }
 0x208   :  { %1253 = vmatpush1.bf16.msra.mxu1 %v3378_v0 }
 0x209   :  { %2502 = vmatprep.subr.bf16.mxu1 %v2911_v3 }
 0x2be   :  { %v3428_v11 = vpop.f32.mrb[0].mxu1 }
 0x2bf   :  { %v1093_v2 = vpack.c.bf16 %v3428_v11, %v3428_v11  ;;  %v3435_v13 = vpop.f32.mrb[1].mxu1 }
 0x2c0   :  { %v1056_v14 = vpop.f32.mrb[2].mxu1 }
 0x2c1   :  { %v1057_v15 = vpop.f32.mrb[3].mxu1  ;;  %1271 = vmatmul.mubr.bf16.vlgmr.msra.gmra.mrb[4].mxu1 %v1093_v2 }
 0x2c2   :  { %2503 = vmatpush3.bf16.msra.mxu1 %v2847_v12  ;;  %2518 = vmatprep.mubr.msk.bf16.mxu1 %vm2912_vm1, %v2911_v3 }
 0x2c3   :  { %2504 = vmatprep.subr.bf16.mxu1 %v2911_v3 }
 0x2c6   :  { %2505 = vmatpush3.bf16.msra.mxu1 %v2848_v16 }
 0x2c7   :  { %2506 = vmatprep.subr.bf16.mxu1 %v2911_v3 }
 0x2ca   :  { %2507 = vmatpush3.bf16.msra.mxu1 %v2849_v17 }
 0x2cb   :  { %2508 = vmatprep.subr.bf16.mxu1 %v2911_v3 }
 0x2ce   :  { %2509 = vmatpush3.bf16.msra.mxu1 %v2850_v18 }
 0x2cf   :  { %2510 = vmatprep.subr.bf16.mxu1 %v2911_v3 }
 0x2d2   :  { %2511 = vmatpush3.bf16.msra.mxu1 %v2851_v19 }
 0x2d3   :  { %2512 = vmatprep.subr.bf16.mxu1 %v2911_v3 }
 0x2d6   :  { %2513 = vmatpush3.bf16.msra.mxu1 %v2852_v20 }
 0x2d7   :  { %2514 = vmatprep.subr.bf16.mxu1 %v2911_v3 }
 0x2da   :  { %2515 = vmatpush3.bf16.msra.mxu1 %v2853_v21 }
 0x2db   :  { %2516 = vmatprep.subr.bf16.mxu1 %v2911_v3 }
 0x2de   :  { %2517 = vmatpush3.bf16.msra.mxu1 %v2854_v22 }
 0x2df   :  { %1320 = vmatprep.subr.bf16.mxu1 %v3286_v51 }
 0x2e1   :  { %2519 = vmatmul.mubr.bf16.vlgmr.msra.gmra.mrb[8].mxu1 %v1093_v2 }
 0x2e2   :  { %1321 = vmatpush1.bf16.msra.mxu1 %v3293_v41  ;;  %1352 = vmatprep.mubr.bf16.mxu1 %v2909_v1  ;;  %v1319_v1 = vpack.c.bf16 %v3435_v13, %v3435_v13 }
 0x2e3   :  { %1322 = vmatprep.subr.bf16.mxu1 %v3299_v42 }
 0x2e6   :  { %1323 = vmatpush1.bf16.msra.mxu1 %v3305_v6 }
 0x2e7   :  { %1324 = vmatprep.subr.bf16.mxu1 %v3312_v53 }
 0x2ea   :  { %1325 = vmatpush1.bf16.msra.mxu1 %v3318_v54 }
 0x2eb   :  { %1326 = vmatprep.subr.bf16.mxu1 %v3324_v55 }
 0x2ee   :  { %1327 = vmatpush1.bf16.msra.mxu1 %v3330_v56 }
 0x2ef   :  { %1328 = vmatprep.subr.bf16.mxu1 %v3336_v57 }
 0x2f2   :  { %1329 = vmatpush1.bf16.msra.mxu1 %v3342_v58  ;;  %v2863_v58 = vld [vmem:[%s3807_s3 + $0xc0] sm:$0xff]  }
 0x2f3   :  { %1330 = vmatprep.subr.bf16.mxu1 %v3348_v59  ;;  %v2865_v59 = vld [vmem:[%s3807_s3 + $0xd0] sm:$0xff]  }
 0x2f6   :  { %1331 = vmatpush1.bf16.msra.mxu1 %v3354_v60  ;;  %v2866_v60 = vld [vmem:[%s3807_s3 + $0xd8] sm:$0xff]  }
 0x2f7   :  { %1332 = vmatprep.subr.bf16.mxu1 %v3360_v61  ;;  %v2867_v61 = vld [vmem:[%s3807_s3 + $0xe0] sm:$0xff]  }
 0x2fa   :  { %1333 = vmatpush1.bf16.msra.mxu1 %v3366_v62  ;;  %v2868_v62 = vld [vmem:[%s3807_s3 + $0xe8] sm:$0xff]  }
 0x2fb   :  { %1334 = vmatprep.subr.bf16.mxu1 %v3372_v63  ;;  %v2869_v63 = vld [vmem:[%s3807_s3 + $0xf0] sm:$0xff]  }
 0x2fe   :  { %1335 = vmatpush1.bf16.msra.mxu1 %v3378_v0  ;;  %v2870_v0 = vld [vmem:[%s3807_s3 + $0xf8] sm:$0xff]  }
 0x2ff   :  { %2522 = vmatprep.subr.bf16.mxu1 %v2911_v3 }
 0x301   :  { %1353 = vmatmul.mubr.bf16.vlgmr.msra.gmra.mrb[12].mxu1 %v1319_v1 }
 0x302   :  { %2523 = vmatpush3.bf16.msra.mxu1 %v2847_v12  ;;  %2538 = vmatprep.mubr.msk.bf16.mxu1 %vm2912_vm1, %v2911_v3 }
 0x303   :  { %2524 = vmatprep.subr.bf16.mxu1 %v2911_v3 }
 0x306   :  { %2525 = vmatpush3.bf16.msra.mxu1 %v2848_v16 }
 0x307   :  { %2526 = vmatprep.subr.bf16.mxu1 %v2911_v3 }
 0x30a   :  { %2527 = vmatpush3.bf16.msra.mxu1 %v2849_v17 }
 0x30b   :  { %2528 = vmatprep.subr.bf16.mxu1 %v2911_v3 }
 0x30e   :  { %2529 = vmatpush3.bf16.msra.mxu1 %v2850_v18 }
 0x30f   :  { %2530 = vmatprep.subr.bf16.mxu1 %v2911_v3 }
 0x312   :  { %2531 = vmatpush3.bf16.msra.mxu1 %v2851_v19 }
 0x313   :  { %2532 = vmatprep.subr.bf16.mxu1 %v2911_v3 }
 0x316   :  { %2533 = vmatpush3.bf16.msra.mxu1 %v2852_v20 }
 0x317   :  { %2534 = vmatprep.subr.bf16.mxu1 %v2911_v3 }
 0x31a   :  { %2535 = vmatpush3.bf16.msra.mxu1 %v2853_v21 }
 0x31b   :  { %2536 = vmatprep.subr.bf16.mxu1 %v2911_v3 }
 0x31e   :  { %2537 = vmatpush3.bf16.msra.mxu1 %v2854_v22 }
 0x31f   :  { %2562 = vmatprep.subr.bf16.mxu1 %v2911_v3 }
 0x321   :  { %2539 = vmatmul.mubr.bf16.vlgmr.msra.gmra.mrb[16].mxu1 %v1319_v1 }
 0x322   :  { %2563 = vmatpush3.bf16.msra.mxu1 %v3387_v4  ;;  %2578 = vmatprep.mubr.msk.bf16.mxu1 %vm2912_vm1, %v2911_v3 }
 0x323   :  { %2564 = vmatprep.subr.bf16.mxu1 %v2911_v3 }
 0x326   :  { %2565 = vmatpush3.bf16.msra.mxu1 %v3396_v5 }
 0x327   :  { %2566 = vmatprep.subr.bf16.mxu1 %v2911_v3 }
 0x32a   :  { %2567 = vmatpush3.bf16.msra.mxu1 %v3403_v7 }
 0x32b   :  { %2568 = vmatprep.subr.bf16.mxu1 %v2911_v3 }
 0x32e   :  { %2569 = vmatpush3.bf16.msra.mxu1 %v3410_v8 }
 0x32f   :  { %2570 = vmatprep.subr.bf16.mxu1 %v2911_v3 }
 0x332   :  { %2571 = vmatpush3.bf16.msra.mxu1 %v3416_v9 }
 0x333   :  { %2572 = vmatprep.subr.bf16.mxu1 %v2911_v3 }
 0x336   :  { %2573 = vmatpush3.bf16.msra.mxu1 %v3423_v10 }
 0x337   :  { %2574 = vmatprep.subr.bf16.mxu1 %v2911_v3 }
 0x33a   :  { %2575 = vmatpush3.bf16.msra.mxu1 %v3498_v23 }
 0x33b   :  { %2576 = vmatprep.subr.bf16.mxu1 %v2911_v3 }
 0x33e   :  { %2577 = vmatpush3.bf16.msra.mxu1 %v3520_v24 }
 0x33f   :  { %2602 = vmatprep.subr.bf16.mxu1 %v2911_v3 }
 0x394   :  { %v1272_v25 = vpop.f32.mrb[4].mxu1 }
 0x395   :  { %v1274_v26 = vpop.f32.mrb[5].mxu1  ;;  %v1273_v47 = vadd.f32 %v1272_v25, %v1098_v35 }
 0x396   :  { %v1276_v27 = vpop.f32.mrb[6].mxu1  ;;  %v1275_v43 = vadd.f32 %v1274_v26, %v1102_v34 }
 0x397   :  { %v1277_v28 = vpop.f32.mrb[7].mxu1 }
 0x3b4   :  { %v1313_v29 = vpop.f32.mrb[8].mxu1 }
 0x3b5   :  { %v2520_v30 = vpop.f32.mrb[9].mxu1  ;;  %v3541_v6 = vadd.f32 %v1313_v29, %v1106_v40 }
 0x3b6   :  { %v1316_v31 = vpop.f32.mrb[10].mxu1  ;;  %v2871_v30 = vld [vmem:[%s3807_s3] sm:$0xff]  }
 0x3b7   :  { %v2521_v32 = vpop.f32.mrb[11].mxu1 }
 0x3d4   :  { %v1354_v37 = vpop.f32.mrb[12].mxu1 }
 0x3d5   :  { %v1356_v39 = vpop.f32.mrb[13].mxu1  ;;  %v1355_v48 = vadd.f32 %v1354_v37, %v1098_v35  ;;  %v2873_v35 = vld [vmem:[%s3807_s3 + $0x10] sm:$0xff]   ;;  %v2874_v37 = vld [vmem:[%s3807_s3 + $0x18] sm:$0xff]  }
 0x3d6   :  { %v1357_v44 = vadd.f32 %v1356_v39, %v1102_v34  ;;  %v1358_v45 = vpop.f32.mrb[14].mxu1  ;;  %v2872_v34 = vld [vmem:[%s3807_s3 + $0x8] sm:$0xff]   ;;  %v2875_v39 = vld [vmem:[%s3807_s3 + $0x20] sm:$0xff]  }
 0x3d7   :  { %v1359_v46 = vpop.f32.mrb[15].mxu1  ;;  %v2878_v45 = vld [vmem:[%s3807_s3 + $0x38] sm:$0xff]  }
 0x3d8   :  { %v1401_v49 = vsub.f32 %v1357_v44, %v1275_v43  ;;  %v2876_v43 = vld [vmem:[%s3807_s3 + $0x28] sm:$0xff]   ;;  %v2877_v44 = vld [vmem:[%s3807_s3 + $0x30] sm:$0xff]  }
 0x3da   :  { %v1419_v50 = vmul.f32 %v1401_v49, %v1273_v47  ;;  %v1509_v51 = vmul.f32 %v1401_v49, %v1355_v48 }
 0x3dc   :  { %v1420_v52 = vpack.c.bf16 %v1419_v50, %v1419_v50  ;;  %v1510_v41 = vpack.c.bf16 %v1509_v51, %v1509_v51 }
 0x3de   :  { %2559 = vmatmul.mubr.bf16.vlgmr.msra.gmra.mrb[128].mxu0 %v1420_v52  ;;  %2579 = vmatmul.mubr.bf16.vlgmr.msra.gmra.mrb[20].mxu1 %v1510_v41 }
 0x3df   :  { %2598 = vmatprep.mubr.msk.bf16.mxu0 %vm2912_vm1, %v2911_v3  ;;  %2618 = vmatprep.mubr.msk.bf16.mxu1 %vm2912_vm1, %v2911_v3 }
 0x3e0   :  { %2583 = vmatpush3.bf16.msra.mxu0 %v2863_v58  ;;  %2603 = vmatpush3.bf16.msra.mxu1 %v2863_v58 }
 0x3e1   :  { %2584 = vmatprep.subr.bf16.mxu0 %v2911_v3  ;;  %2604 = vmatprep.subr.bf16.mxu1 %v2911_v3 }
 0x3e4   :  { %2585 = vmatpush3.bf16.msra.mxu0 %v2864_v36  ;;  %2605 = vmatpush3.bf16.msra.mxu1 %v2864_v36 }
 0x3e5   :  { %2586 = vmatprep.subr.bf16.mxu0 %v2911_v3  ;;  %2606 = vmatprep.subr.bf16.mxu1 %v2911_v3 }
 0x3e8   :  { %2587 = vmatpush3.bf16.msra.mxu0 %v2865_v59  ;;  %2607 = vmatpush3.bf16.msra.mxu1 %v2865_v59 }
 0x3e9   :  { %2588 = vmatprep.subr.bf16.mxu0 %v2911_v3  ;;  %2608 = vmatprep.subr.bf16.mxu1 %v2911_v3 }
 0x3ec   :  { %2589 = vmatpush3.bf16.msra.mxu0 %v2866_v60  ;;  %2609 = vmatpush3.bf16.msra.mxu1 %v2866_v60 }
 0x3ed   :  { %2590 = vmatprep.subr.bf16.mxu0 %v2911_v3  ;;  %2610 = vmatprep.subr.bf16.mxu1 %v2911_v3 }
 0x3f0   :  { %2591 = vmatpush3.bf16.msra.mxu0 %v2867_v61  ;;  %2611 = vmatpush3.bf16.msra.mxu1 %v2867_v61 }
 0x3f1   :  { %2592 = vmatprep.subr.bf16.mxu0 %v2911_v3  ;;  %2612 = vmatprep.subr.bf16.mxu1 %v2911_v3 }
 0x3f4   :  { %v1395_v42 = vpop.f32.mrb[16].mxu1  ;;  %2593 = vmatpush3.bf16.msra.mxu0 %v2868_v62  ;;  %2613 = vmatpush3.bf16.msra.mxu1 %v2868_v62 }
 0x3f5   :  { %v3543_v53 = vadd.f32 %v1395_v42, %v1106_v40  ;;  %v2540_v54 = vpop.f32.mrb[17].mxu1  ;;  %2594 = vmatprep.subr.bf16.mxu0 %v2911_v3  ;;  %2614 = vmatprep.subr.bf16.mxu1 %v2911_v3 }
 0x3f6   :  { %v1398_v55 = vpop.f32.mrb[18].mxu1 }
 0x3f7   :  { %v2541_v56 = vpop.f32.mrb[19].mxu1  ;;  %v3547_v57 = vsub.f32 %v3543_v53, %v3541_v6 }
 0x3f8   :  { %2595 = vmatpush3.bf16.msra.mxu0 %v2869_v63  ;;  %2615 = vmatpush3.bf16.msra.mxu1 %v2869_v63 }
 0x3f9   :  { %2596 = vmatprep.subr.bf16.mxu0 %v2911_v3  ;;  %2616 = vmatprep.subr.bf16.mxu1 %v2911_v3 }
 0x3fc   :  { %2597 = vmatpush3.bf16.msra.mxu0 %v2870_v0  ;;  %2617 = vmatpush3.bf16.msra.mxu1 %v2870_v0 }
 0x3fd   :  { %2622 = vmatprep.subr.bf16.mxu0 %v2911_v3  ;;  %2642 = vmatprep.subr.bf16.mxu1 %v2911_v3 }
 0x4b1   :  { %v1503_v12 = vpop.f32.mrb[128].mxu0  ;;  %v1545_v2 = vpop.f32.mrb[20].mxu1 }
 0x4b2   :  { %v1551_v14 = vmul.f32 -0.35355338, %v1503_v12  ;;  %v1557_v15 = vmul.f32 0.35355338, %v1545_v2  ;;  %v2560_v16 = vpop.f32.mrb[129].mxu0  ;;  %v2580_v17 = vpop.f32.mrb[21].mxu1 }
 0x4b3   :  { %v1506_v18 = vpop.f32.mrb[130].mxu0  ;;  %v1548_v19 = vpop.f32.mrb[22].mxu1 }
 0x4b4   :  { %v1552_v20 = vmul.f32 1.442695, %v1551_v14  ;;  %v1558_v21 = vmul.f32 1.442695, %v1557_v15  ;;  %v2561_v22 = vpop.f32.mrb[131].mxu0  ;;  %v2581_v1 = vpop.f32.mrb[23].mxu1 }
 0x4b6   :  { %2887 = vpow2.f32 %v1552_v20 }
 0x4b7   :  { %2889 = vpow2.f32 %v1558_v21 }
 0x4c0   :  { %v2888_v25 = vpop.eup %2887 }
 0x4c1   :  { %v2890_v26 = vpop.eup %2889  ;;  %v1554_v27 = vadd.f32 1.0, %v2888_v25 }
 0x4c2   :  { %v1560_v28 = vadd.f32 1.0, %v2890_v26 }
 0x4c3   :  { %2891 = vrcp.f32 %v1554_v27 }
 0x4c4   :  { %2893 = vrcp.f32 %v1560_v28 }
 0x4cd   :  { %v2892_v29 = vpop.eup %2891 }
 0x4ce   :  { %v2894_v31 = vpop.eup %2893  ;;  %v1579_v32 = vpack.c.bf16 %v2892_v29, %v2892_v29 }
 0x4cf   :  { %v1668_v33 = vpack.c.bf16 %v2894_v31, %v2894_v31 }
 0x4d0   :  { %2599 = vmatmul.mubr.bf16.vlgmr.msra.gmra.mrb[132].mxu0 %v1579_v32 }
 0x4d1   :  { %2619 = vmatmul.mubr.bf16.vlgmr.msra.gmra.mrb[24].mxu1 %v1668_v33  ;;  %2623 = vmatpush3.bf16.msra.mxu0 %v2871_v30 }
 0x4d2   :  { %2643 = vmatpush3.bf16.msra.mxu1 %v2871_v30  ;;  %2624 = vmatprep.subr.bf16.mxu0 %v2911_v3 }
 0x4d3   :  { %2644 = vmatprep.subr.bf16.mxu1 %v2911_v3  ;;  %2638 = vmatprep.mubr.msk.bf16.mxu0 %vm2912_vm1, %v2911_v3 }
 0x4d4   :  { %2658 = vmatprep.mubr.msk.bf16.mxu1 %vm2912_vm1, %v2911_v3 }
 0x4d5   :  { %2625 = vmatpush3.bf16.msra.mxu0 %v2872_v34 }
 0x4d6   :  { %2645 = vmatpush3.bf16.msra.mxu1 %v2872_v34  ;;  %2626 = vmatprep.subr.bf16.mxu0 %v2911_v3 }
 0x4d7   :  { %2646 = vmatprep.subr.bf16.mxu1 %v2911_v3 }
 0x4d9   :  { %2627 = vmatpush3.bf16.msra.mxu0 %v2873_v35 }
 0x4da   :  { %2647 = vmatpush3.bf16.msra.mxu1 %v2873_v35  ;;  %2628 = vmatprep.subr.bf16.mxu0 %v2911_v3 }
 0x4db   :  { %2648 = vmatprep.subr.bf16.mxu1 %v2911_v3 }
 0x4dd   :  { %2629 = vmatpush3.bf16.msra.mxu0 %v2874_v37 }
 0x4de   :  { %2649 = vmatpush3.bf16.msra.mxu1 %v2874_v37  ;;  %2630 = vmatprep.subr.bf16.mxu0 %v2911_v3  ;;  %v1860_v37 = vld [vmem:[%s3805_s4 + $0x3] ss:$0 sm:$0xff] }
 0x4df   :  { %2650 = vmatprep.subr.bf16.mxu1 %v2911_v3 }
 0x4e1   :  { %2631 = vmatpush3.bf16.msra.mxu0 %v2875_v39 }
 0x4e2   :  { %2651 = vmatpush3.bf16.msra.mxu1 %v2875_v39  ;;  %2632 = vmatprep.subr.bf16.mxu0 %v2911_v3 }
 0x4e3   :  { %2652 = vmatprep.subr.bf16.mxu1 %v2911_v3 }
 0x4e5   :  { %2633 = vmatpush3.bf16.msra.mxu0 %v2876_v43 }
 0x4e6   :  { %2653 = vmatpush3.bf16.msra.mxu1 %v2876_v43  ;;  %2634 = vmatprep.subr.bf16.mxu0 %v2911_v3 }
 0x4e7   :  { %2654 = vmatprep.subr.bf16.mxu1 %v2911_v3 }
 0x4e9   :  { %2635 = vmatpush3.bf16.msra.mxu0 %v2877_v44 }
 0x4ea   :  { %2655 = vmatpush3.bf16.msra.mxu1 %v2877_v44  ;;  %2636 = vmatprep.subr.bf16.mxu0 %v2911_v3  ;;  %v1861_v44 = vld [vmem:[%s3805_s4 + $0x4] ss:$0 sm:$0xff] }
 0x4eb   :  { %2656 = vmatprep.subr.bf16.mxu1 %v2911_v3 }
 0x4ed   :  { %2637 = vmatpush3.bf16.msra.mxu0 %v2878_v45 }
 0x4ee   :  { %2657 = vmatpush3.bf16.msra.mxu1 %v2878_v45  ;;  %2662 = vmatprep.subr.bf16.mxu0 %v2911_v3 }
 0x4ef   :  { %2682 = vmatprep.subr.bf16.mxu1 %v2911_v3 }
 0x5a3   :  { %v1662_v46 = vpop.f32.mrb[132].mxu0 }
 0x5a4   :  { %v1709_v47 = vmul.f32 %v1662_v46, %v3547_v57  ;;  %v1703_v48 = vpop.f32.mrb[24].mxu1  ;;  %v2600_v49 = vpop.f32.mrb[133].mxu0 }
 0x5a5   :  { %v1711_v50 = vmul.f32 %v1703_v48, %v3547_v57  ;;  %v2620_v51 = vpop.f32.mrb[25].mxu1  ;;  %v1665_v52 = vpop.f32.mrb[134].mxu0 }
 0x5a6   :  { %v1710_v41 = vadd.f32 %v1709_v47, %v3541_v6  ;;  %v1706_v38 = vpop.f32.mrb[26].mxu1  ;;  %v2601_v40 = vpop.f32.mrb[135].mxu0  ;;  %v1729_v6 = vld [vmem:[%s3805_s4 + $0x2] ss:$0 sm:$0xff] }
 0x5a7   :  { %v1712_v42 = vsub.f32 %v3543_v53, %v1711_v50  ;;  %v2621_v54 = vpop.f32.mrb[27].mxu1 }
 0x5a8   :  { %v1730_v55 = vpack.c.bf16 %v1710_v41, %v1710_v41  ;;  %v1899_v41 = vld [vmem:[%s3805_s4 + $0x5] ss:$0 sm:$0xff] }
 0x5a9   :  { %v1819_v56 = vpack.c.bf16 %v1712_v42, %v1712_v42 }
 0x5aa   :  { %2639 = vmatmul.mubr.bf16.vlgmr.msra.gmra.mrb[136].mxu0 %v1730_v55 }
 0x5ab   :  { %2659 = vmatmul.mubr.bf16.vlgmr.msra.gmra.mrb[28].mxu1 %v1819_v56  ;;  %2663 = vmatpush3.bf16.msra.mxu0 %v3387_v4 }
 0x5ac   :  { %2664 = vmatprep.subr.bf16.mxu0 %v2911_v3  ;;  %2678 = vmatprep.mubr.msk.bf16.mxu0 %vm2912_vm1, %v2911_v3 }
 0x5ad   :  { %2698 = vmatprep.mubr.msk.bf16.mxu1 %vm2912_vm1, %v2911_v3 }
 0x5af   :  { %2665 = vmatpush3.bf16.msra.mxu0 %v3396_v5 }
 0x5b0   :  { %2666 = vmatprep.subr.bf16.mxu0 %v2911_v3 }
 0x5b3   :  { %2667 = vmatpush3.bf16.msra.mxu0 %v3403_v7 }
 0x5b4   :  { %2668 = vmatprep.subr.bf16.mxu0 %v2911_v3 }
 0x5b7   :  { %2669 = vmatpush3.bf16.msra.mxu0 %v3410_v8 }
 0x5b8   :  { %2670 = vmatprep.subr.bf16.mxu0 %v2911_v3 }
 0x5bb   :  { %2671 = vmatpush3.bf16.msra.mxu0 %v3416_v9 }
 0x5bc   :  { %2672 = vmatprep.subr.bf16.mxu0 %v2911_v3 }
 0x5bf   :  { %2673 = vmatpush3.bf16.msra.mxu0 %v3423_v10 }
 0x5c0   :  { %2674 = vmatprep.subr.bf16.mxu0 %v2911_v3 }
 0x5c3   :  { %2675 = vmatpush3.bf16.msra.mxu0 %v3498_v23 }
 0x5c4   :  { %2676 = vmatprep.subr.bf16.mxu0 %v2911_v3 }
 0x5c7   :  { %2677 = vmatpush3.bf16.msra.mxu0 %v3520_v24 }
 0x5c8   :  { %2702 = vmatprep.subr.bf16.mxu0 %v2911_v3 }
 0x67d   :  { %v1813_v53 = vpop.f32.mrb[136].mxu0 }
 0x67e   :  { %v1814_v57 = vadd.f32 %v1813_v53, %v1729_v6  ;;  %v1854_v58 = vpop.f32.mrb[28].mxu1  ;;  %v2640_v36 = vpop.f32.mrb[137].mxu0 }
 0x67f   :  { %v1855_v59 = vadd.f32 %v1854_v58, %v1729_v6  ;;  %v2660_v60 = vpop.f32.mrb[29].mxu1  ;;  %v1816_v61 = vpop.f32.mrb[138].mxu0 }
 0x680   :  { %v1862_v62 = vadd.f32 %v1814_v57, %v3428_v11  ;;  %v1857_v63 = vpop.f32.mrb[30].mxu1  ;;  %v2641_v0 = vpop.f32.mrb[139].mxu0 }
 0x681   :  { %v1881_v12 = vadd.f32 %v1855_v59, %v3435_v13  ;;  %v2661_v2 = vpop.f32.mrb[31].mxu1 }
 0x682   :  { %v1864_v14 = vsel %vm1863_vm2, %v1862_v62, 0.0  ;;  %v1867_v15 = vmul.f32 %v1862_v62, %v1862_v62 }
 0x683   :  { %v1882_v16 = vsel %vm1863_vm2, %v1881_v12, 0.0  ;;  %1865 = vadd.xlane.f32.xlu0 %v1864_v14  ;;  %v1885_v17 = vmul.f32 %v1881_v12, %v1881_v12 }
 0x684   :  { %1883 = vadd.xlane.f32.xlu1 %v1882_v16  ;;  %v1868_v18 = vsel %vm1863_vm2, %v1867_v15, 0.0 }
 0x685   :  { %v1886_v19 = vsel %vm1863_vm2, %v1885_v17, 0.0 }
 0x687   :  { %1869 = vadd.xlane.f32.xlu0 %v1868_v18 }
 0x688   :  { %1887 = vadd.xlane.f32.xlu1 %v1886_v19 }
 0x710   :  { %v1866_v11 = vpop.xlane.xlu0 %1865 }
 0x711   :  { %v1884_v20 = vpop.xlane.xlu1 %1883  ;;  %v1871_v21 = vmul.f32 0.03125, %v1866_v11 }
 0x712   :  { %v1889_v22 = vmul.f32 0.03125, %v1884_v20 }
 0x713   :  { %v1873_v1 = vmul.f32 %v1871_v21, %v1871_v21  ;;  %v1875_v33 = vsub.f32 %v1862_v62, %v1871_v21 }
 0x714   :  { %v1870_v13 = vpop.xlane.xlu0 %1869  ;;  %v1891_v27 = vmul.f32 %v1889_v22, %v1889_v22  ;;  %v1893_v35 = vsub.f32 %v1881_v12, %v1889_v22 }
 0x715   :  { %v1888_v25 = vpop.xlane.xlu1 %1887  ;;  %v1872_v26 = vmul.f32 0.03125, %v1870_v13 }
 0x716   :  { %v1890_v28 = vmul.f32 0.03125, %v1888_v25 }
 0x717   :  { %v1874_v29 = vsub.f32 %v1872_v26, %v1873_v1 }
 0x718   :  { %v1892_v30 = vsub.f32 %v1890_v28, %v1891_v27  ;;  %v2913_v28 = vmov -1.0  }
 0x719   :  { %v1876_v31 = vadd.f32 1e-05, %v1874_v29 }
 0x71a   :  { %v1894_v32 = vadd.f32 1e-05, %v1892_v30 }
 0x71b   :  { %2895 = vrsqrt.f32 %v1876_v31 }
 0x71c   :  { %2897 = vrsqrt.f32 %v1894_v32 }
 0x725   :  { %v2896_v34 = vpop.eup %2895 }
 0x726   :  { %v2898_v39 = vpop.eup %2897  ;;  %v1878_v43 = vmul.f32 %v2896_v34, %v1875_v33 }
 0x727   :  { %v1896_v45 = vmul.f32 %v2898_v39, %v1893_v35 }
 0x728   :  { %v1879_v46 = vmul.f32 %v1878_v43, %v1860_v37 }
 0x729   :  { %v1897_v47 = vmul.f32 %v1896_v45, %v1860_v37 }
 0x72a   :  { %v1880_v48 = vadd.f32 %v1879_v46, %v1861_v44 }
 0x72b   :  { %v1898_v49 = vadd.f32 %v1897_v47, %v1861_v44 }
 0x72c   :  { %v1917_v50 = vpack.c.bf16 %v1880_v48, %v1880_v48 }
 0x72d   :  { %v3672_v51 = vadd.f32 %v1898_v49, %v1880_v48  ;;  %v2076_v52 = vpack.c.bf16 %v1898_v49, %v1898_v49 }
 0x72e   :  { %2679 = vmatmul.mubr.bf16.vlgmr.msra.gmra.mrb[140].mxu0 %v1917_v50 }
 0x72f   :  { %2703 = vmatpush3.bf16.msra.mxu0 %v3387_v4  ;;  %2718 = vmatprep.mubr.msk.bf16.mxu0 %vm2912_vm1, %v2911_v3 }
 0x730   :  { %2704 = vmatprep.subr.bf16.mxu0 %v2911_v3 }
 0x733   :  { %2705 = vmatpush3.bf16.msra.mxu0 %v3396_v5 }
 0x734   :  { %2706 = vmatprep.subr.bf16.mxu0 %v2911_v3 }
 0x737   :  { %2707 = vmatpush3.bf16.msra.mxu0 %v3403_v7 }
 0x738   :  { %2708 = vmatprep.subr.bf16.mxu0 %v2911_v3 }
 0x73b   :  { %2709 = vmatpush3.bf16.msra.mxu0 %v3410_v8 }
 0x73c   :  { %2710 = vmatprep.subr.bf16.mxu0 %v2911_v3 }
 0x73f   :  { %2711 = vmatpush3.bf16.msra.mxu0 %v3416_v9 }
 0x740   :  { %2712 = vmatprep.subr.bf16.mxu0 %v2911_v3 }
 0x743   :  { %2713 = vmatpush3.bf16.msra.mxu0 %v3423_v10 }
 0x744   :  { %2714 = vmatprep.subr.bf16.mxu0 %v2911_v3 }
 0x747   :  { %2715 = vmatpush3.bf16.msra.mxu0 %v3498_v23 }
 0x748   :  { %2716 = vmatprep.subr.bf16.mxu0 %v2911_v3 }
 0x74b   :  { %2717 = vmatpush3.bf16.msra.mxu0 %v3520_v24 }
 0x74c   :  { %2742 = vmatprep.subr.bf16.mxu0 %v2911_v3 }
 0x74e   :  { %2719 = vmatmul.mubr.bf16.vlgmr.msra.gmra.mrb[144].mxu0 %v2076_v52 }
 0x74f   :  { %2743 = vmatpush3.bf16.msra.mxu0 %v3387_v4  ;;  %2758 = vmatprep.mubr.msk.bf16.mxu0 %vm2912_vm1, %v2911_v3  ;;  %v3712_v4 = vld [vmem:[%s3807_s3 + $0x80] sm:$0xff]  }
 0x750   :  { %2744 = vmatprep.subr.bf16.mxu0 %v2911_v3  ;;  %2683 = vmatpush3.bf16.msra.mxu1 %v3712_v4 }
 0x751   :  { %2684 = vmatprep.subr.bf16.mxu1 %v2911_v3 }
 0x753   :  { %2745 = vmatpush3.bf16.msra.mxu0 %v3396_v5  ;;  %v3719_v5 = vld [vmem:[%s3807_s3 + $0x88] sm:$0xff]  }
 0x754   :  { %2746 = vmatprep.subr.bf16.mxu0 %v2911_v3  ;;  %2685 = vmatpush3.bf16.msra.mxu1 %v3719_v5 }
 0x755   :  { %2686 = vmatprep.subr.bf16.mxu1 %v2911_v3 }
 0x757   :  { %2747 = vmatpush3.bf16.msra.mxu0 %v3403_v7  ;;  %v3726_v7 = vld [vmem:[%s3807_s3 + $0x90] sm:$0xff]  }
 0x758   :  { %2748 = vmatprep.subr.bf16.mxu0 %v2911_v3  ;;  %2687 = vmatpush3.bf16.msra.mxu1 %v3726_v7 }
 0x759   :  { %2688 = vmatprep.subr.bf16.mxu1 %v2911_v3 }
 0x75b   :  { %2749 = vmatpush3.bf16.msra.mxu0 %v3410_v8  ;;  %v3733_v8 = vld [vmem:[%s3807_s3 + $0x98] sm:$0xff]  }
 0x75c   :  { %2750 = vmatprep.subr.bf16.mxu0 %v2911_v3  ;;  %2689 = vmatpush3.bf16.msra.mxu1 %v3733_v8 }
 0x75d   :  { %2690 = vmatprep.subr.bf16.mxu1 %v2911_v3 }
 0x75f   :  { %2751 = vmatpush3.bf16.msra.mxu0 %v3416_v9  ;;  %v3740_v9 = vld [vmem:[%s3807_s3 + $0xa0] sm:$0xff]  }
 0x760   :  { %2752 = vmatprep.subr.bf16.mxu0 %v2911_v3  ;;  %2691 = vmatpush3.bf16.msra.mxu1 %v3740_v9 }
 0x761   :  { %2692 = vmatprep.subr.bf16.mxu1 %v2911_v3 }
 0x763   :  { %2753 = vmatpush3.bf16.msra.mxu0 %v3423_v10  ;;  %v3747_v10 = vld [vmem:[%s3807_s3 + $0xa8] sm:$0xff]  }
 0x764   :  { %2754 = vmatprep.subr.bf16.mxu0 %v2911_v3  ;;  %2693 = vmatpush3.bf16.msra.mxu1 %v3747_v10 }
 0x765   :  { %2694 = vmatprep.subr.bf16.mxu1 %v2911_v3 }
 0x767   :  { %2755 = vmatpush3.bf16.msra.mxu0 %v3498_v23  ;;  %v3754_v23 = vld [vmem:[%s3807_s3 + $0xb0] sm:$0xff]  }
 0x768   :  { %2756 = vmatprep.subr.bf16.mxu0 %v2911_v3  ;;  %2695 = vmatpush3.bf16.msra.mxu1 %v3754_v23 }
 0x769   :  { %2696 = vmatprep.subr.bf16.mxu1 %v2911_v3 }
 0x76b   :  { %2757 = vmatpush3.bf16.msra.mxu0 %v3520_v24  ;;  %v3761_v24 = vld [vmem:[%s3807_s3 + $0xb8] sm:$0xff]  }
 0x76c   :  { %2697 = vmatpush3.bf16.msra.mxu1 %v3761_v24 }
 0x76d   :  { %2722 = vmatprep.subr.bf16.mxu1 %v2911_v3 }
 0x801   :  { %v1952_v38 = vpop.f32.mrb[140].mxu0 }
 0x802   :  { %v1953_v40 = vadd.f32 %v1952_v38, %v1899_v41  ;;  %v2680_v42 = vpop.f32.mrb[141].mxu0 }
 0x803   :  { %v1955_v54 = vpop.f32.mrb[142].mxu0 }
 0x804   :  { %v1959_v55 = vmul.f32 0.70710677, %v1953_v40  ;;  %v2681_v56 = vpop.f32.mrb[143].mxu0  ;;  %v1958_v31 = vmul.f32 0.5, %v1953_v40 }
 0x806   :  { %v1962_v6 = vand.u32 2147483647, %v1959_v55  ;;  %vm1960_vm3 = vcmp.ge.f32.partialorder %v1959_v55, 0.0 }
 0x807   :  { %v1961_v29 = vsel %vm1960_vm3, 1.0, %v2913_v28 }
 0x808   :  { %v1963_v53 = vmul.f32 0.3275911, %v1962_v6  ;;  %v1976_v58 = vsub.f32 0.0, %v1962_v6 }
 0x80a   :  { %v1964_v57 = vadd.f32 1.0, %v1963_v53  ;;  %v1977_v59 = vmul.f32 %v1976_v58, %v1962_v6 }
 0x80c   :  { %2899 = vrcp.f32 %v1964_v57  ;;  %v1978_v62 = vmul.f32 1.442695, %v1977_v59 }
 0x80e   :  { %2901 = vpow2.f32 %v1978_v62 }
 0x816   :  { %v2900_v36 = vpop.eup %2899 }
 0x817   :  { %v1967_v60 = vmul.f32 1.0614054, %v2900_v36 }
 0x818   :  { %v2902_v13 = vpop.eup %2901 }
 0x819   :  { %v1968_v61 = vadd.f32 -1.4531521, %v1967_v60 }
 0x81b   :  { %v1969_v63 = vmul.f32 %v2900_v36, %v1968_v61 }
 0x81d   :  { %v1970_v0 = vadd.f32 1.4214138, %v1969_v63 }
 0x81f   :  { %v1971_v12 = vmul.f32 %v2900_v36, %v1970_v0 }
 0x821   :  { %v1972_v2 = vadd.f32 -0.28449672, %v1971_v12  ;;  %v2111_v14 = vpop.f32.mrb[144].mxu0 }
 0x822   :  { %v2112_v15 = vadd.f32 %v2111_v14, %v1899_v41  ;;  %v2720_v16 = vpop.f32.mrb[145].mxu0 }
 0x823   :  { %v1973_v17 = vmul.f32 %v2900_v36, %v1972_v2  ;;  %v2114_v18 = vpop.f32.mrb[146].mxu0 }
 0x824   :  { %v2118_v19 = vmul.f32 0.70710677, %v2112_v15  ;;  %v2721_v11 = vpop.f32.mrb[147].mxu0 }
 0x825   :  { %v1974_v20 = vadd.f32 0.2548296, %v1973_v17  ;;  %v2190_v17 = vld [vmem:[%s3805_s4 + $0x18] ss:$0 sm:$0xff] }
 0x826   :  { %v2121_v21 = vand.u32 2147483647, %v2118_v19  ;;  %vm2119_vm4 = vcmp.ge.f32.partialorder %v2118_v19, 0.0 }
 0x827   :  { %v1975_v22 = vmul.f32 %v2900_v36, %v1974_v20  ;;  %v2120_v38 = vsel %vm2119_vm4, 1.0, %v2913_v28  ;;  %v2209_v20 = vld [vmem:[%s3805_s4 + $0x19] ss:$0 sm:$0xff] }
 0x828   :  { %v2122_v1 = vmul.f32 0.3275911, %v2121_v21  ;;  %v2135_v34 = vsub.f32 0.0, %v2121_v21 }
 0x829   :  { %v1980_v25 = vmul.f32 %v2902_v13, %v1975_v22 }
 0x82a   :  { %v2123_v26 = vadd.f32 1.0, %v2122_v1  ;;  %v2136_v39 = vmul.f32 %v2135_v34, %v2121_v21 }
 0x82b   :  { %v1981_v27 = vsub.f32 1.0, %v1980_v25 }
 0x82c   :  { %2903 = vrcp.f32 %v2123_v26  ;;  %v2137_v45 = vmul.f32 1.442695, %v2136_v39 }
 0x82d   :  { %v1982_v30 = vmul.f32 %v1981_v27, %v1961_v29 }
 0x82e   :  { %2905 = vpow2.f32 %v2137_v45 }
 0x82f   :  { %v1983_v32 = vadd.f32 1.0, %v1982_v30 }
 0x831   :  { %v1984_v33 = vmul.f32 %v1983_v32, %v1958_v31 }
 0x833   :  { %v1985_v35 = vpack.c.bf16 %v1984_v33, %v1984_v33 }
 0x835   :  { %2699 = vmatmul.mubr.bf16.vlgmr.msra.gmra.mrb[32].mxu1 %v1985_v35 }
 0x836   :  { %v2904_v37 = vpop.eup %2903  ;;  %2723 = vmatpush3.bf16.msra.mxu1 %v3712_v4  ;;  %2738 = vmatprep.mubr.msk.bf16.mxu1 %vm2912_vm1, %v2911_v3 }
 0x837   :  { %v2126_v43 = vmul.f32 1.0614054, %v2904_v37  ;;  %2724 = vmatprep.subr.bf16.mxu1 %v2911_v3 }
 0x839   :  { %v2127_v44 = vadd.f32 -1.4531521, %v2126_v43 }
 0x83a   :  { %2725 = vmatpush3.bf16.msra.mxu1 %v3719_v5  ;;  %v2906_v5 = vpop.eup %2905 }
 0x83b   :  { %v2128_v46 = vmul.f32 %v2904_v37, %v2127_v44  ;;  %2726 = vmatprep.subr.bf16.mxu1 %v2911_v3 }
 0x83d   :  { %v2129_v47 = vadd.f32 1.4214138, %v2128_v46 }
 0x83e   :  { %2727 = vmatpush3.bf16.msra.mxu1 %v3726_v7 }
 0x83f   :  { %v2130_v48 = vmul.f32 %v2904_v37, %v2129_v47  ;;  %2728 = vmatprep.subr.bf16.mxu1 %v2911_v3 }
 0x841   :  { %v2131_v49 = vadd.f32 -0.28449672, %v2130_v48 }
 0x842   :  { %2729 = vmatpush3.bf16.msra.mxu1 %v3733_v8  ;;  %v2117_v8 = vmul.f32 0.5, %v2112_v15  ;;  %v2189_v15 = vld [vmem:[%s3805_s4 + $0x7] ss:$0 sm:$0xff] }
 0x843   :  { %v2132_v50 = vmul.f32 %v2904_v37, %v2131_v49  ;;  %2730 = vmatprep.subr.bf16.mxu1 %v2911_v3 }
 0x845   :  { %v2133_v52 = vadd.f32 0.2548296, %v2132_v50 }
 0x846   :  { %2731 = vmatpush3.bf16.msra.mxu1 %v3740_v9 }
 0x847   :  { %v2134_v4 = vmul.f32 %v2904_v37, %v2133_v52  ;;  %2732 = vmatprep.subr.bf16.mxu1 %v2911_v3 }
 0x849   :  { %v2139_v41 = vmul.f32 %v2906_v5, %v2134_v4 }
 0x84a   :  { %2733 = vmatpush3.bf16.msra.mxu1 %v3747_v10  ;;  %v1900_v10 = vld [vmem:[%s3805_s4 + $0x6] ss:$0 sm:$0xff] }
 0x84b   :  { %v2140_v7 = vsub.f32 1.0, %v2139_v41  ;;  %2734 = vmatprep.subr.bf16.mxu1 %v2911_v3  ;;  %v2763_v55 = vadd.f32 %v3672_v51, %v1900_v10 }
 0x84d   :  { %v2141_v40 = vmul.f32 %v2140_v7, %v2120_v38  ;;  %v2764_v56 = vadd.f32 %v2763_v55, %v1900_v10 }
 0x84e   :  { %2735 = vmatpush3.bf16.msra.mxu1 %v3754_v23 }
 0x84f   :  { %v2142_v42 = vadd.f32 1.0, %v2141_v40  ;;  %2736 = vmatprep.subr.bf16.mxu1 %v2911_v3 }
 0x851   :  { %v2143_v9 = vmul.f32 %v2142_v42, %v2117_v8 }
 0x852   :  { %2737 = vmatpush3.bf16.msra.mxu1 %v3761_v24 }
 0x853   :  { %v2144_v54 = vpack.c.bf16 %v2143_v9, %v2143_v9 }
 0x855   :  { %2739 = vmatmul.mubr.bf16.vlgmr.msra.gmra.mrb[32].mxu1 %v2144_v54 }
 0x928   :  { %v2179_v6 = vpop.f32.mrb[32].mxu1 }
 0x929   :  { %v2765_v53 = vadd.f32 %v2764_v56, %v2179_v6  ;;  %v2740_v57 = vpop.f32.mrb[33].mxu1 }
 0x92a   :  { %v2182_v23 = vpop.f32.mrb[34].mxu1 }
 0x92b   :  { %v2188_v58 = vmul.f32 0.5, %v2765_v53  ;;  %v2741_v36 = vpop.f32.mrb[35].mxu1 }
 0x92d   :  { %v2191_v3 = vsel %vm1863_vm2, %v2188_v58, 0.0  ;;  %v2194_v59 = vmul.f32 %v2188_v58, %v2188_v58 }
 0x92e   :  { %2192 = vadd.xlane.f32.xlu0 %v2191_v3 }
 0x92f   :  { %v2195_v24 = vsel %vm1863_vm2, %v2194_v59, 0.0 }
 0x930   :  { %2196 = vadd.xlane.f32.xlu1 %v2195_v24 }
 0x9bb   :  { %v2193_v60 = vpop.xlane.xlu0 %2192 }
 0x9bc   :  { %v2198_v61 = vmul.f32 0.03125, %v2193_v60 }
 0x9bd   :  { %v2197_v62 = vpop.xlane.xlu1 %2196 }
 0x9be   :  { %v2200_v63 = vmul.f32 %v2198_v61, %v2198_v61  ;;  %v2199_v0 = vmul.f32 0.03125, %v2197_v62  ;;  %v2202_v2 = vsub.f32 %v2188_v58, %v2198_v61 }
 0x9c0   :  { %v2201_v51 = vsub.f32 %v2199_v0, %v2200_v63 }
 0x9c2   :  { %v2203_v12 = vadd.f32 1e-05, %v2201_v51 }
 0x9c4   :  { %2907 = vrsqrt.f32 %v2203_v12 }
 0x9ce   :  { %v2908_v14 = vpop.eup %2907 }
 0x9cf   :  { %v2205_v16 = vmul.f32 %v2908_v14, %v2202_v2 }
 0x9d1   :  { %v2206_v18 = vmul.f32 %v2205_v16, %v2189_v15 }
 0x9d3   :  { %v2207_v19 = vadd.f32 %v2206_v18, %v2190_v17 }
 0x9d5   :  { %v2208_v11 = vpack.c.bf16 %v2207_v19, %v2207_v19 }
 0x9d7   :  { %2759 = vmatmul.mubr.bf16.vlgmr.msra.gmra.mrb[148].mxu0 %v2208_v11 }
 0xaaa   :  { %v2244_v21 = vpop.f32.mrb[148].mxu0 }
 0xaab   :  { %v2245_v22 = vadd.f32 %v2244_v21, %v2209_v20  ;;  %v2760_v13 = vpop.f32.mrb[149].mxu0 }
 0xaac   :  { %v2247_v1 = vpop.f32.mrb[150].mxu0 }
 0xaad   :  { %2250 = vst [vmem:[%s3808_s5] sm:$0x3] %v2245_v22  ;;  %v2761_v25 = vpop.f32.mrb[151].mxu0 }

</bundles_post_ra>
